<compile_context>
chip_gen: v6e
topology: v6e:2x2x1
jax: 0.10.0
libtpu: 0.0.40
codegen_flags: <defaults>
</compile_context>

<pallas_src>
import functools
import math

import jax
import jax.numpy as jnp
from jax.experimental import pallas as pl
from jax.experimental.pallas import tpu as pltpu


def _round_up(x, m):
    return (x + m - 1) // m * m


def _vmem_limit(buffered_bytes):
    # `buffered_bytes` already counts double buffering; add 50% headroom for
    # compiler-internal scratch.  Floor 8 MiB, cap 56 MiB (v7x has 64 MiB).
    want = int(buffered_bytes * 1.5)
    return max(8 * 1024 * 1024, min(want, 56 * 1024 * 1024))


def _project_kernel(feat_ref, w_ref, z_ref):
    """Stage 1: z tile = feat tile @ [W_self^T | W_neigh^T] (stacked RHS)."""
    z_ref[...] = jnp.dot(
        feat_ref[...], w_ref[...], preferred_element_type=jnp.float32
    ).astype(z_ref.dtype)


def _aggregate_stream_kernel(adj_ref, zs_ref, zn_ref, out_ref, acc_ref):
    """Stage 2 (streamed z_neigh): out[i] = z_self[i] + sum_k A[i,k] @ z_neigh[k]."""
    k = pl.program_id(1)

    @pl.when(k == 0)
    def _init():
        acc_ref[...] = zs_ref[...].astype(jnp.float32)

    acc_ref[...] += jnp.dot(
        adj_ref[...], zn_ref[...], preferred_element_type=jnp.float32
    )

    @pl.when(k == pl.num_programs(1) - 1)
    def _finalize():
        out_ref[...] = acc_ref[...].astype(out_ref.dtype)


def _aggregate_resident_kernel(adj_ref, zs_ref, zn_ref, out_ref, acc_ref, *, tk):
    """Stage 2 (VMEM-resident z_neigh): same math, z_neigh sliced in-kernel."""
    k = pl.program_id(1)

    @pl.when(k == 0)
    def _init():
        acc_ref[...] = zs_ref[...].astype(jnp.float32)

    off = pl.multiple_of(k * tk, tk)
    acc_ref[...] += jnp.dot(
        adj_ref[...], zn_ref[pl.ds(off, tk), :], preferred_element_type=jnp.float32
    )

    @pl.when(k == pl.num_programs(1) - 1)
    def _finalize():
        out_ref[...] = acc_ref[...].astype(out_ref.dtype)


@functools.partial(
    jax.jit, static_argnames=("tm", "tk", "compute_dtype", "max_resident_bytes")
)
def sage_conv_mean(adj_norm, feat, w_self, w_neigh, *, tm=512, tk=512,
                   compute_dtype=jnp.float32,
                   max_resident_bytes=16 * 1024 * 1024):
    """SAGEConv 'mean' forward: feat @ W_self^T + A_norm @ (feat @ W_neigh^T)."""
    n, d_in = feat.shape
    d_out = w_neigh.shape[0]
    itemsize = jnp.dtype(compute_dtype).itemsize

    # Lane-dense padded feature dims (multiples of 128).
    dp_in = _round_up(d_in, 128)
    dp_out = _round_up(d_out, 128)

    # Tiles: multiples of 128; clamp to padded node count; pad rows/cols of the
    # square adjacency to the tile lcm so both grid axes divide exactly.
    n128 = _round_up(n, 128)
    tm = max(128, min(_round_up(tm, 128), n128))
    tk = max(128, min(_round_up(tk, 128), n128))
    n_pad = _round_up(n128, math.lcm(tm, tk))

    # Zero-pad inputs; pre-transpose + stack weights (lane-dense MXU RHS).
    adj_p = jnp.pad(adj_norm.astype(compute_dtype),
                    ((0, n_pad - n), (0, n_pad - n)))
    feat_p = jnp.pad(feat.astype(compute_dtype),
                     ((0, n_pad - n), (0, dp_in - d_in)))
    ws_t = jnp.pad(w_self.T.astype(compute_dtype),
                   ((0, dp_in - d_in), (0, dp_out - d_out)))
    wn_t = jnp.pad(w_neigh.T.astype(compute_dtype),
                   ((0, dp_in - d_in), (0, dp_out - d_out)))
    w_cat = jnp.concatenate([ws_t, wn_t], axis=1)          # (dp_in, 2*dp_out)

    # ---- Stage 1: z = feat @ [W_self^T | W_neigh^T], tiled over node rows ----
    tp = tk                                                 # divides n_pad
    proj_bytes = 2 * (tp * dp_in + dp_in * 2 * dp_out + tp * 2 * dp_out) * itemsize
    z = pl.pallas_call(
        _project_kernel,
        out_shape=jax.ShapeDtypeStruct((n_pad, 2 * dp_out), compute_dtype),
        grid_spec=pltpu.PrefetchScalarGridSpec(
            num_scalar_prefetch=0,
            grid=(n_pad // tp,),
            in_specs=[
                pl.BlockSpec((tp, dp_in), lambda r: (r, 0)),
                pl.BlockSpec((dp_in, 2 * dp_out), lambda r: (0, 0)),
            ],
            out_specs=pl.BlockSpec((tp, 2 * dp_out), lambda r: (r, 0)),
        ),
        compiler_params=pltpu.CompilerParams(
            dimension_semantics=("parallel",),
            vmem_limit_bytes=_vmem_limit(proj_bytes)),
    )(feat_p, w_cat)

    # ---- Stage 2: out = z_self + A_norm @ z_neigh, grid (row tiles, k) ----
    zn_resident_bytes = 2 * n_pad * dp_out * itemsize       # 2 bufs allocated
    resident = zn_resident_bytes <= max_resident_bytes

    base_bytes = (2 * tm * tk * itemsize                    # adjacency tile
                  + 2 * tm * dp_out * itemsize              # z_self tile
                  + 2 * tm * dp_out * 4                     # f32 out tile
                  + tm * dp_out * 4)                        # f32 accumulator
    if resident:
        # Single DMA; block index constant across the whole grid -> stays in VMEM.
        zn_spec = pl.BlockSpec((n_pad, dp_out), lambda i, k: (0, 1))
        agg_kernel = functools.partial(_aggregate_resident_kernel, tk=tk)
        agg_bytes = base_bytes + zn_resident_bytes
    else:
        zn_spec = pl.BlockSpec((tk, dp_out), lambda i, k: (k, 1))
        agg_kernel = _aggregate_stream_kernel
        agg_bytes = base_bytes + 2 * tk * dp_out * itemsize

    out_p = pl.pallas_call(
        agg_kernel,
        out_shape=jax.ShapeDtypeStruct((n_pad, dp_out), jnp.float32),
        grid_spec=pltpu.PrefetchScalarGridSpec(
            num_scalar_prefetch=0,
            grid=(n_pad // tm, n_pad // tk),
            in_specs=[
                pl.BlockSpec((tm, tk), lambda i, k: (i, k)),      # A_norm tile
                pl.BlockSpec((tm, dp_out), lambda i, k: (i, 0)),  # z_self tile
                zn_spec,                                          # z_neigh
            ],
            out_specs=pl.BlockSpec((tm, dp_out), lambda i, k: (i, 0)),
            scratch_shapes=[pltpu.VMEM((tm, dp_out), jnp.float32)],
        ),
        compiler_params=pltpu.CompilerParams(
            dimension_semantics=("parallel", "arbitrary"),
            vmem_limit_bytes=_vmem_limit(agg_bytes)),
    )(adj_p, z, z)

    return out_p[:n, :d_out]


def xavier_uniform(key, shape, gain):
    # Matches nn.init.xavier_uniform_ for a (fan_out, fan_in) Linear weight.
    fan_out, fan_in = shape
    bound = gain * (6.0 / (fan_in + fan_out)) ** 0.5
    return jax.random.uniform(key, shape, jnp.float32, -bound, bound)


def reference(adj_norm, feat, w_self, w_neigh):
    hp = jax.lax.Precision.HIGHEST
    h_neigh = jnp.dot(adj_norm, feat, precision=hp)
    return (jnp.dot(feat, w_self.T, precision=hp)
            + jnp.dot(h_neigh, w_neigh.T, precision=hp))


if __name__ == "__main__":
    # Small, module-consistent shapes: N nodes, D_in input feats, D_out output feats.
    N, D_IN, D_OUT = 512, 256, 128
    TM, TK = 256, 256            # multiples of 256; >=2 row tiles for v7x megacore

    key = jax.random.PRNGKey(0)
    k_feat, k_adj, k_self, k_neigh = jax.random.split(key, 4)

    feat = jax.random.normal(k_feat, (N, D_IN), jnp.float32)

    # Deterministic random directed graph; edge j->i sends feat[j] to node i.
    adj = jax.random.bernoulli(k_adj, 0.1, (N, N)).astype(jnp.float32)
    adj = adj * (1.0 - jnp.eye(N, dtype=jnp.float32))            # drop self loops
    in_deg = adj.sum(axis=1, keepdims=True)                      # in-degree per dst
    adj_norm = adj / jnp.maximum(in_deg, 1.0)                    # mean; isolated -> 0

    gain = 2.0 ** 0.5                                            # calculate_gain('relu')
    w_self = xavier_uniform(k_self, (D_OUT, D_IN), gain)         # fc_self.weight
    w_neigh = xavier_uniform(k_neigh, (D_OUT, D_IN), gain)       # fc_neigh.weight

    ref = reference(adj_norm, feat, w_self, w_neigh)

    # VMEM-resident z_neigh path (default).
    out = sage_conv_mean(adj_norm, feat, w_self, w_neigh, tm=TM, tk=TK)
    out = jax.block_until_ready(out)
    assert out.shape == (N, D_OUT)
    assert jnp.allclose(out, ref, atol=2e-3, rtol=2e-3), "resident path mismatch"

    # Streaming z_neigh fallback path (forced via max_resident_bytes=0).
    out_s = sage_conv_mean(adj_norm, feat, w_self, w_neigh, tm=TM, tk=TK,
                           max_resident_bytes=0)
    out_s = jax.block_until_ready(out_s)
    assert jnp.allclose(out_s, ref, atol=2e-3, rtol=2e-3), "streaming path mismatch"

    print("KERNEL_OK")
</pallas_src>

<mosaic_0001>
module attributes {stable_mosaic.version = 11 : i64} {
  func.func @_project_kernel(%arg0: i32, %arg1: memref<256x256xf32, #tpu.memory_space<vmem>>, %arg2: memref<256x256xf32, #tpu.memory_space<vmem>>, %arg3: memref<256x256xf32, #tpu.memory_space<vmem>>) attributes {dimension_semantics = [#tpu.dimension_semantics<parallel>], iteration_bounds = array<i64: 2>, scalar_prefetch = 0 : i64, scratch_operands = 0 : i64, tpu.core_type = #tpu.core_type<tc>, window_params = [{transform_indices = @transform_0, window_bounds = array<i64: 256, 256>}, {pipeline_mode = #tpu.pipeline_mode<synchronous>, transform_indices = @transform_1, window_bounds = array<i64: 256, 256>}, {transform_indices = @transform_2, window_bounds = array<i64: 256, 256>}]} {
    %c0 = arith.constant 0 : index
    %c0_0 = arith.constant 0 : index
    %0 = vector.load %arg1[%c0, %c0_0] : memref<256x256xf32, #tpu.memory_space<vmem>>, vector<256x256xf32>
    %c0_1 = arith.constant 0 : index
    %c0_2 = arith.constant 0 : index
    %1 = vector.load %arg2[%c0_1, %c0_2] : memref<256x256xf32, #tpu.memory_space<vmem>>, vector<256x256xf32>
    %cst = arith.constant dense<0.000000e+00> : vector<256x256xf32>
    %2 = tpu.matmul %0, %1, %cst {dimension_numbers = #tpu.dot_dimension_numbers<[1], [0], [0], [1], [0, 0, 1, 1], [], []>} : vector<256x256xf32>, vector<256x256xf32>, vector<256x256xf32> -> vector<256x256xf32>
    %c0_3 = arith.constant 0 : index
    %c0_4 = arith.constant 0 : index
    %3 = vector.load %arg3[%c0_3, %c0_4] : memref<256x256xf32, #tpu.memory_space<vmem>>, vector<256x256xf32>
    tpu.vector_store %arg3[%c0_3, %c0_4], %2 {strides = array<i32>} : memref<256x256xf32, #tpu.memory_space<vmem>>, vector<256x256xf32>,
    return
  }
  func.func @transform_0(%arg0: i32) -> (i32, i32) {
    %c0_i32 = arith.constant 0 : i32
    %c0_i32_0 = arith.constant 0 : i32
    return %arg0, %c0_i32 : i32, i32
  }
  func.func @transform_1(%arg0: i32) -> (i32, i32) {
    %c0_i32 = arith.constant 0 : i32
    %c0_i32_0 = arith.constant 0 : i32
    %c0_i32_1 = arith.constant 0 : i32
    return %c0_i32, %c0_i32_0 : i32, i32
  }
  func.func @transform_2(%arg0: i32) -> (i32, i32) {
    %c0_i32 = arith.constant 0 : i32
    %c0_i32_0 = arith.constant 0 : i32
    return %arg0, %c0_i32 : i32, i32
  }
}

module attributes {stable_mosaic.version = 11 : i64} {
  func.func @_aggregate_resident_kernel(%arg0: i32, %arg1: i32, %arg2: memref<256x256xf32, #tpu.memory_space<vmem>>, %arg3: memref<256x128xf32, #tpu.memory_space<vmem>>, %arg4: memref<512x128xf32, #tpu.memory_space<vmem>>, %arg5: memref<256x128xf32, #tpu.memory_space<vmem>>, %arg6: memref<256x128xf32, #tpu.memory_space<vmem>>) attributes {dimension_semantics = [#tpu.dimension_semantics<parallel>, #tpu.dimension_semantics<arbitrary>], iteration_bounds = array<i64: 2, 2>, scalar_prefetch = 0 : i64, scratch_operands = 1 : i64, tpu.core_type = #tpu.core_type<tc>, window_params = [{transform_indices = @transform_0, window_bounds = array<i64: 256, 256>}, {transform_indices = @transform_1, window_bounds = array<i64: 256, 128>}, {transform_indices = @transform_2, window_bounds = array<i64: 512, 128>}, {transform_indices = @transform_3, window_bounds = array<i64: 256, 128>}]} {
    %c0_i32 = arith.constant 0 : i32
    %0 = arith.cmpi eq, %arg1, %c0_i32 : i32
    %1 = arith.extui %0 : i1 to i32
    %c0_i32_0 = arith.constant 0 : i32
    %2 = arith.cmpi ne, %1, %c0_i32_0 : i32
    scf.if %2 {
      %c0_8 = arith.constant 0 : index
      %c0_9 = arith.constant 0 : index
      %15 = vector.load %arg3[%c0_8, %c0_9] : memref<256x128xf32, #tpu.memory_space<vmem>>, vector<256x128xf32>
      %c0_10 = arith.constant 0 : index
      %c0_11 = arith.constant 0 : index
      %16 = vector.load %arg6[%c0_10, %c0_11] : memref<256x128xf32, #tpu.memory_space<vmem>>, vector<256x128xf32>
      tpu.vector_store %arg6[%c0_10, %c0_11], %15 {strides = array<i32>} : memref<256x128xf32, #tpu.memory_space<vmem>>, vector<256x128xf32>,
    } else {
    }
    %c256_i32 = arith.constant 256 : i32
    %3 = arith.muli %arg1, %c256_i32 : i32
    %4 = tpu.assume_multiple %3, 256 : i32
    %c0 = arith.constant 0 : index
    %c0_1 = arith.constant 0 : index
    %5 = vector.load %arg6[%c0, %c0_1] : memref<256x128xf32, #tpu.memory_space<vmem>>, vector<256x128xf32>
    %c0_2 = arith.constant 0 : index
    %c0_3 = arith.constant 0 : index
    %6 = vector.load %arg2[%c0_2, %c0_3] : memref<256x256xf32, #tpu.memory_space<vmem>>, vector<256x256xf32>
    %7 = arith.index_cast %4 : i32 to index
    %c0_4 = arith.constant 0 : index
    %8 = vector.load %arg4[%7, %c0_4] : memref<512x128xf32, #tpu.memory_space<vmem>>, vector<256x128xf32>
    %cst = arith.constant dense<0.000000e+00> : vector<256x128xf32>
    %9 = tpu.matmul %6, %8, %cst {dimension_numbers = #tpu.dot_dimension_numbers<[1], [0], [0], [1], [0, 0, 1, 1], [], []>} : vector<256x256xf32>, vector<256x128xf32>, vector<256x128xf32> -> vector<256x128xf32>
    %10 = arith.addf %5, %9 : vector<256x128xf32>
    %c0_5 = arith.constant 0 : index
    %c0_6 = arith.constant 0 : index
    %11 = vector.load %arg6[%c0_5, %c0_6] : memref<256x128xf32, #tpu.memory_space<vmem>>, vector<256x128xf32>
    tpu.vector_store %arg6[%c0_5, %c0_6], %10 {strides = array<i32>} : memref<256x128xf32, #tpu.memory_space<vmem>>, vector<256x128xf32>,
    %c1_i32 = arith.constant 1 : i32
    %12 = arith.cmpi eq, %arg1, %c1_i32 : i32
    %13 = arith.extui %12 : i1 to i32
    %c0_i32_7 = arith.constant 0 : i32
    %14 = arith.cmpi ne, %13, %c0_i32_7 : i32
    scf.if %14 {
      %c0_8 = arith.constant 0 : index
      %c0_9 = arith.constant 0 : index
      %15 = vector.load %arg6[%c0_8, %c0_9] : memref<256x128xf32, #tpu.memory_space<vmem>>, vector<256x128xf32>
      %c0_10 = arith.constant 0 : index
      %c0_11 = arith.constant 0 : index
      %16 = vector.load %arg5[%c0_10, %c0_11] : memref<256x128xf32, #tpu.memory_space<vmem>>, vector<256x128xf32>
      tpu.vector_store %arg5[%c0_10, %c0_11], %15 {strides = array<i32>} : memref<256x128xf32, #tpu.memory_space<vmem>>, vector<256x128xf32>,
    } else {
    }
    return
  }
  func.func @transform_0(%arg0: i32, %arg1: i32) -> (i32, i32) {
    %c0_i32 = arith.constant 0 : i32
    return %arg0, %arg1 : i32, i32
  }
  func.func @transform_1(%arg0: i32, %arg1: i32) -> (i32, i32) {
    %c0_i32 = arith.constant 0 : i32
    %c0_i32_0 = arith.constant 0 : i32
    return %arg0, %c0_i32 : i32, i32
  }
  func.func @transform_2(%arg0: i32, %arg1: i32) -> (i32, i32) {
    %c0_i32 = arith.constant 0 : i32
    %c1_i32 = arith.constant 1 : i32
    %c0_i32_0 = arith.constant 0 : i32
    return %c0_i32, %c1_i32 : i32, i32
  }
  func.func @transform_3(%arg0: i32, %arg1: i32) -> (i32, i32) {
    %c0_i32 = arith.constant 0 : i32
    %c0_i32_0 = arith.constant 0 : i32
    return %arg0, %c0_i32 : i32, i32
  }
}

</mosaic_0001>

<bundles_post_ra>
// kernel: sage_conv_mean.2
= control target key start
LH: loop header
LB: loop body
LE: loop exit
PB: predicated region body
PF: predicated region fallthrough
CT: control target
= control target key end

     0   :  { %s769_s9 = smov 0   ;;  %s1119_s0 = inlined_call_operand.vmem [shape: f32[512,256], index: 0, kind: input, shape index: {}]   ;;  %s1120_s1 = inlined_call_operand.vmem [shape: f32[256,256], index: 1, kind: input, shape index: {}]   ;;  %s1121_s2 = inlined_call_operand.vmem [shape: f32[512,256], index: 2, kind: output, shape index: {}]  }
   0x1 LB: > { %s659_s10 = sadd.s32 4294967295, %s752_s9   ;;  %p663_p0 = scmp.ge.s32.totalorder %s752_s9, 1  ;;  %s752_s9 = sphi %s769_s9, %s12_s9  }
   0x2   : > { %p114_p1 = scmp.lt.s32.totalorder %s752_s9, 3 }
   0x4   : > { %p115_p2 = pnand %p663_p0, %p114_p1 }
   0x5   : > { %s664_s29 = sshll.u32 (!%p115_p2), %s659_s10, 5 }
   0x6   : > { %118 = sbr.rel (%p115_p2) target bundleno = 333 (0x14d), region = 28  ;;  %p139_p3 = scmp.lt.s32.totalorder (!%p115_p2), %s664_s29, 63 }
   0xb   : > { %v247_v0 = vld [vmem:[%s1120_s1 + $0xf8] sm:$0xff]  ;;  %v246_v1 = vld [vmem:[%s1120_s1 + $0xf0] sm:$0xff]  ;;  %v245_v2 = vld [vmem:[%s1120_s1 + $0xe8] sm:$0xff]  ;;  %s1123_s29 = smov (!%p139_p3, %s664_s29), 63 }
   0xc   : > { %280 = vmatprep.subr.mxu0 %v247_v0  ;;  %674 = vmatprep.subr.mxu1 %v247_v0  ;;  %v244_v3 = vld [vmem:[%s1120_s1 + $0xe0] sm:$0xff]  ;;  %v243_v4 = vld [vmem:[%s1120_s1 + $0xd8] sm:$0xff]  ;;  %v242_v5 = vld [vmem:[%s1120_s1 + $0xd0] sm:$0xff]  ;;  %s672_s25 = sshll.u32 %s1123_s29, 4 }
   0xd   : > { %281 = vmatpush1.msra.mxu0 %v246_v1  ;;  %706 = vmatpush1.msra.mxu1 %v246_v1  ;;  %v241_v6 = vld [vmem:[%s1120_s1 + $0xc8] sm:$0xff]  ;;  %v240_v7 = vld [vmem:[%s1120_s1 + $0xc0] sm:$0xff]  ;;  %v239_v8 = vld [vmem:[%s1120_s1 + $0xb8] sm:$0xff]  ;;  %s973_s7 = scalar_lea.vmem %s1119_s0, %s672_s25  ;;  %s1050_s15 = scalar_lea.vmem %s1121_s2, %s672_s25 }
   0xe   : > { %282 = vmatprep.subr.mxu0 %v245_v2  ;;  %675 = vmatprep.subr.mxu1 %v245_v2  ;;  %v238_v9 = vld [vmem:[%s1120_s1 + $0xb0] sm:$0xff]  ;;  %v237_v10 = vld [vmem:[%s1120_s1 + $0xa8] sm:$0xff]  ;;  %v236_v11 = vld [vmem:[%s1120_s1 + $0xa0] sm:$0xff] }
   0xf   : > { %283 = vmatpush1.msra.mxu0 %v244_v3  ;;  %707 = vmatpush1.msra.mxu1 %v244_v3  ;;  %v235_v12 = vld [vmem:[%s1120_s1 + $0x98] sm:$0xff]  ;;  %v234_v13 = vld [vmem:[%s1120_s1 + $0x90] sm:$0xff]  ;;  %v233_v14 = vld [vmem:[%s1120_s1 + $0x88] sm:$0xff] }
  0x10   : > { %284 = vmatprep.subr.mxu0 %v243_v4  ;;  %676 = vmatprep.subr.mxu1 %v243_v4  ;;  %v232_v15 = vld [vmem:[%s1120_s1 + $0x80] sm:$0xff]  ;;  %v231_v16 = vld [vmem:[%s1120_s1 + $0x78] sm:$0xff]  ;;  %v230_v17 = vld [vmem:[%s1120_s1 + $0x70] sm:$0xff] }
  0x11   : > { %285 = vmatpush1.msra.mxu0 %v242_v5  ;;  %708 = vmatpush1.msra.mxu1 %v242_v5  ;;  %v229_v18 = vld [vmem:[%s1120_s1 + $0x68] sm:$0xff]  ;;  %v228_v19 = vld [vmem:[%s1120_s1 + $0x60] sm:$0xff]  ;;  %v227_v20 = vld [vmem:[%s1120_s1 + $0x58] sm:$0xff] }
  0x12   : > { %286 = vmatprep.subr.mxu0 %v241_v6  ;;  %677 = vmatprep.subr.mxu1 %v241_v6  ;;  %v226_v21 = vld [vmem:[%s1120_s1 + $0x50] sm:$0xff]  ;;  %v225_v22 = vld [vmem:[%s1120_s1 + $0x48] sm:$0xff]  ;;  %v224_v23 = vld [vmem:[%s1120_s1 + $0x40] sm:$0xff] }
  0x13   : > { %287 = vmatpush1.msra.mxu0 %v240_v7  ;;  %709 = vmatpush1.msra.mxu1 %v240_v7  ;;  %v223_v24 = vld [vmem:[%s1120_s1 + $0x38] sm:$0xff]  ;;  %v222_v25 = vld [vmem:[%s1120_s1 + $0x30] sm:$0xff]  ;;  %v221_v26 = vld [vmem:[%s1120_s1 + $0x28] sm:$0xff] }
  0x14   : > { %288 = vmatprep.subr.mxu0 %v239_v8  ;;  %678 = vmatprep.subr.mxu1 %v239_v8  ;;  %v220_v27 = vld [vmem:[%s1120_s1 + $0x20] sm:$0xff]  ;;  %v219_v28 = vld [vmem:[%s1120_s1 + $0x18] sm:$0xff]  ;;  %v218_v29 = vld [vmem:[%s1120_s1 + $0x10] sm:$0xff] }
  0x15   : > { %289 = vmatpush1.msra.mxu0 %v238_v9  ;;  %710 = vmatpush1.msra.mxu1 %v238_v9  ;;  %v217_v30 = vld [vmem:[%s1120_s1 + $0x8] sm:$0xff]  ;;  %v216_v31 = vld [vmem:[%s1120_s1] sm:$0xff]  ;;  %v279_v32 = vld [vmem:[%s1120_s1 + $0x1f8] sm:$0xff] }
  0x16   : > { %290 = vmatprep.subr.mxu0 %v237_v10  ;;  %679 = vmatprep.subr.mxu1 %v237_v10  ;;  %v278_v33 = vld [vmem:[%s1120_s1 + $0x1f0] sm:$0xff]  ;;  %v277_v34 = vld [vmem:[%s1120_s1 + $0x1e8] sm:$0xff]  ;;  %v276_v35 = vld [vmem:[%s1120_s1 + $0x1e0] sm:$0xff] }
  0x17   : > { %291 = vmatpush1.msra.mxu0 %v236_v11  ;;  %711 = vmatpush1.msra.mxu1 %v236_v11  ;;  %v275_v36 = vld [vmem:[%s1120_s1 + $0x1d8] sm:$0xff]  ;;  %v274_v37 = vld [vmem:[%s1120_s1 + $0x1d0] sm:$0xff]  ;;  %v273_v38 = vld [vmem:[%s1120_s1 + $0x1c8] sm:$0xff] }
  0x18   : > { %292 = vmatprep.subr.mxu0 %v235_v12  ;;  %680 = vmatprep.subr.mxu1 %v235_v12  ;;  %v272_v39 = vld [vmem:[%s1120_s1 + $0x1c0] sm:$0xff]  ;;  %v271_v40 = vld [vmem:[%s1120_s1 + $0x1b8] sm:$0xff]  ;;  %v270_v41 = vld [vmem:[%s1120_s1 + $0x1b0] sm:$0xff] }
  0x19   : > { %293 = vmatpush1.msra.mxu0 %v234_v13  ;;  %712 = vmatpush1.msra.mxu1 %v234_v13  ;;  %v269_v42 = vld [vmem:[%s1120_s1 + $0x1a8] sm:$0xff]  ;;  %v268_v43 = vld [vmem:[%s1120_s1 + $0x1a0] sm:$0xff]  ;;  %v267_v44 = vld [vmem:[%s1120_s1 + $0x198] sm:$0xff] }
  0x1a   : > { %294 = vmatprep.subr.mxu0 %v233_v14  ;;  %681 = vmatprep.subr.mxu1 %v233_v14  ;;  %v266_v45 = vld [vmem:[%s1120_s1 + $0x190] sm:$0xff]  ;;  %v265_v46 = vld [vmem:[%s1120_s1 + $0x188] sm:$0xff]  ;;  %v264_v47 = vld [vmem:[%s1120_s1 + $0x180] sm:$0xff] }
  0x1b   : > { %295 = vmatpush1.msra.mxu0 %v232_v15  ;;  %713 = vmatpush1.msra.mxu1 %v232_v15  ;;  %v263_v48 = vld [vmem:[%s1120_s1 + $0x178] sm:$0xff]  ;;  %v262_v49 = vld [vmem:[%s1120_s1 + $0x170] sm:$0xff]  ;;  %v261_v50 = vld [vmem:[%s1120_s1 + $0x168] sm:$0xff] }
  0x1c   : > { %296 = vmatprep.subr.mxu0 %v231_v16  ;;  %682 = vmatprep.subr.mxu1 %v231_v16  ;;  %v260_v51 = vld [vmem:[%s1120_s1 + $0x160] sm:$0xff]  ;;  %v259_v52 = vld [vmem:[%s1120_s1 + $0x158] sm:$0xff]  ;;  %v258_v53 = vld [vmem:[%s1120_s1 + $0x150] sm:$0xff] }
  0x1d   : > { %297 = vmatpush1.msra.mxu0 %v230_v17  ;;  %714 = vmatpush1.msra.mxu1 %v230_v17  ;;  %v257_v54 = vld [vmem:[%s1120_s1 + $0x148] sm:$0xff]  ;;  %v256_v55 = vld [vmem:[%s1120_s1 + $0x140] sm:$0xff]  ;;  %v255_v56 = vld [vmem:[%s1120_s1 + $0x138] sm:$0xff] }
  0x1e   : > { %298 = vmatprep.subr.mxu0 %v229_v18  ;;  %683 = vmatprep.subr.mxu1 %v229_v18  ;;  %v254_v57 = vld [vmem:[%s1120_s1 + $0x130] sm:$0xff]  ;;  %v253_v58 = vld [vmem:[%s1120_s1 + $0x128] sm:$0xff]  ;;  %v252_v59 = vld [vmem:[%s1120_s1 + $0x120] sm:$0xff] }
  0x1f   : > { %299 = vmatpush1.msra.mxu0 %v228_v19  ;;  %715 = vmatpush1.msra.mxu1 %v228_v19  ;;  %v251_v60 = vld [vmem:[%s1120_s1 + $0x118] sm:$0xff]  ;;  %v250_v61 = vld [vmem:[%s1120_s1 + $0x110] sm:$0xff]  ;;  %v249_v62 = vld [vmem:[%s1120_s1 + $0x108] sm:$0xff] }
  0x20   : > { %300 = vmatprep.subr.mxu0 %v227_v20  ;;  %684 = vmatprep.subr.mxu1 %v227_v20  ;;  %v248_v63 = vld [vmem:[%s1120_s1 + $0x100] sm:$0xff]  ;;  %v153_v0 = vld [vmem:[%s973_s7 + $0x8] sm:$0xff]  ;;  %v155_v4 = vld [vmem:[%s973_s7 + $0x18] sm:$0xff] }
  0x21   : > { %301 = vmatpush1.msra.mxu0 %v226_v21  ;;  %716 = vmatpush1.msra.mxu1 %v226_v21  ;;  %v185_v1 = vld [vmem:[%s973_s7 + $0x108] sm:$0xff]  ;;  %v152_v2 = vld [vmem:[%s973_s7] sm:$0xff]  ;;  %v187_v5 = vld [vmem:[%s973_s7 + $0x118] sm:$0xff] }
  0x22   : > { %302 = vmatprep.subr.mxu0 %v225_v22  ;;  %685 = vmatprep.subr.mxu1 %v225_v22  ;;  %v184_v3 = vld [vmem:[%s973_s7 + $0x100] sm:$0xff]  ;;  %v154_v6 = vld [vmem:[%s973_s7 + $0x10] sm:$0xff]  ;;  %v157_v8 = vld [vmem:[%s973_s7 + $0x28] sm:$0xff] }
  0x23   : > { %303 = vmatpush1.msra.mxu0 %v224_v23  ;;  %717 = vmatpush1.msra.mxu1 %v224_v23  ;;  %v186_v7 = vld [vmem:[%s973_s7 + $0x110] sm:$0xff]  ;;  %v189_v9 = vld [vmem:[%s973_s7 + $0x128] sm:$0xff]  ;;  %v156_v10 = vld [vmem:[%s973_s7 + $0x20] sm:$0xff] }
  0x24   : > { %304 = vmatprep.subr.mxu0 %v223_v24  ;;  %686 = vmatprep.subr.mxu1 %v223_v24  ;;  %v188_v11 = vld [vmem:[%s973_s7 + $0x120] sm:$0xff]  ;;  %v159_v12 = vld [vmem:[%s973_s7 + $0x38] sm:$0xff]  ;;  %v158_v14 = vld [vmem:[%s973_s7 + $0x30] sm:$0xff] }
  0x25   : > { %305 = vmatpush1.msra.mxu0 %v222_v25  ;;  %718 = vmatpush1.msra.mxu1 %v222_v25  ;;  %v191_v13 = vld [vmem:[%s973_s7 + $0x138] sm:$0xff]  ;;  %v190_v15 = vld [vmem:[%s973_s7 + $0x130] sm:$0xff]  ;;  %v161_v16 = vld [vmem:[%s973_s7 + $0x48] sm:$0xff] }
  0x26   : > { %306 = vmatprep.subr.mxu0 %v221_v26  ;;  %687 = vmatprep.subr.mxu1 %v221_v26  ;;  %v193_v17 = vld [vmem:[%s973_s7 + $0x148] sm:$0xff]  ;;  %v160_v18 = vld [vmem:[%s973_s7 + $0x40] sm:$0xff]  ;;  %v163_v20 = vld [vmem:[%s973_s7 + $0x58] sm:$0xff] }
  0x27   : > { %307 = vmatpush1.msra.mxu0 %v220_v27  ;;  %719 = vmatpush1.msra.mxu1 %v220_v27  ;;  %v192_v19 = vld [vmem:[%s973_s7 + $0x140] sm:$0xff]  ;;  %v195_v21 = vld [vmem:[%s973_s7 + $0x158] sm:$0xff]  ;;  %v162_v22 = vld [vmem:[%s973_s7 + $0x50] sm:$0xff] }
  0x28   : > { %308 = vmatprep.subr.mxu0 %v219_v28  ;;  %688 = vmatprep.subr.mxu1 %v219_v28  ;;  %v194_v23 = vld [vmem:[%s973_s7 + $0x150] sm:$0xff]  ;;  %v165_v24 = vld [vmem:[%s973_s7 + $0x68] sm:$0xff]  ;;  %v164_v26 = vld [vmem:[%s973_s7 + $0x60] sm:$0xff] }
  0x29   : > { %309 = vmatpush1.msra.mxu0 %v218_v29  ;;  %720 = vmatpush1.msra.mxu1 %v218_v29  ;;  %v197_v25 = vld [vmem:[%s973_s7 + $0x168] sm:$0xff]  ;;  %v196_v27 = vld [vmem:[%s973_s7 + $0x160] sm:$0xff]  ;;  %v167_v28 = vld [vmem:[%s973_s7 + $0x78] sm:$0xff] }
  0x2a   : > { %310 = vmatprep.subr.mxu0 %v217_v30  ;;  %689 = vmatprep.subr.mxu1 %v217_v30  ;;  %v199_v29 = vld [vmem:[%s973_s7 + $0x178] sm:$0xff]  ;;  %v166_v30 = vld [vmem:[%s973_s7 + $0x70] sm:$0xff] }
  0x2b   : > { %311 = vmatpush1.msra.mxu0 %v216_v31  ;;  %721 = vmatpush1.msra.mxu1 %v216_v31  ;;  %v198_v31 = vld [vmem:[%s973_s7 + $0x170] sm:$0xff] }
  0x2c   : > { %312 = vmatprep.subr.mxu0 %v279_v32  ;;  %690 = vmatprep.subr.mxu1 %v279_v32  ;;  %v169_v32 = vld [vmem:[%s973_s7 + $0x88] sm:$0xff] }
  0x2d   : > { %313 = vmatpush2.msra.mxu0 %v278_v33  ;;  %722 = vmatpush2.msra.mxu1 %v278_v33  ;;  %v201_v33 = vld [vmem:[%s973_s7 + $0x188] sm:$0xff] }
  0x2e   : > { %314 = vmatprep.subr.mxu0 %v277_v34  ;;  %691 = vmatprep.subr.mxu1 %v277_v34  ;;  %v168_v34 = vld [vmem:[%s973_s7 + $0x80] sm:$0xff] }
  0x2f   : > { %315 = vmatpush2.msra.mxu0 %v276_v35  ;;  %723 = vmatpush2.msra.mxu1 %v276_v35  ;;  %v200_v35 = vld [vmem:[%s973_s7 + $0x180] sm:$0xff] }
  0x30   : > { %316 = vmatprep.subr.mxu0 %v275_v36  ;;  %692 = vmatprep.subr.mxu1 %v275_v36  ;;  %v171_v36 = vld [vmem:[%s973_s7 + $0x98] sm:$0xff] }
  0x31   : > { %317 = vmatpush2.msra.mxu0 %v274_v37  ;;  %724 = vmatpush2.msra.mxu1 %v274_v37  ;;  %v203_v37 = vld [vmem:[%s973_s7 + $0x198] sm:$0xff] }
  0x32   : > { %318 = vmatprep.subr.mxu0 %v273_v38  ;;  %693 = vmatprep.subr.mxu1 %v273_v38  ;;  %v170_v38 = vld [vmem:[%s973_s7 + $0x90] sm:$0xff] }
  0x33   : > { %319 = vmatpush2.msra.mxu0 %v272_v39  ;;  %725 = vmatpush2.msra.mxu1 %v272_v39  ;;  %v202_v39 = vld [vmem:[%s973_s7 + $0x190] sm:$0xff] }
  0x34   : > { %320 = vmatprep.subr.mxu0 %v271_v40  ;;  %694 = vmatprep.subr.mxu1 %v271_v40  ;;  %v173_v40 = vld [vmem:[%s973_s7 + $0xa8] sm:$0xff] }
  0x35   : > { %321 = vmatpush2.msra.mxu0 %v270_v41  ;;  %726 = vmatpush2.msra.mxu1 %v270_v41  ;;  %v205_v41 = vld [vmem:[%s973_s7 + $0x1a8] sm:$0xff] }
  0x36   : > { %322 = vmatprep.subr.mxu0 %v269_v42  ;;  %695 = vmatprep.subr.mxu1 %v269_v42  ;;  %v172_v42 = vld [vmem:[%s973_s7 + $0xa0] sm:$0xff] }
  0x37   : > { %323 = vmatpush2.msra.mxu0 %v268_v43  ;;  %727 = vmatpush2.msra.mxu1 %v268_v43  ;;  %v204_v43 = vld [vmem:[%s973_s7 + $0x1a0] sm:$0xff] }
  0x38   : > { %324 = vmatprep.subr.mxu0 %v267_v44  ;;  %696 = vmatprep.subr.mxu1 %v267_v44  ;;  %v175_v44 = vld [vmem:[%s973_s7 + $0xb8] sm:$0xff] }
  0x39   : > { %325 = vmatpush2.msra.mxu0 %v266_v45  ;;  %728 = vmatpush2.msra.mxu1 %v266_v45  ;;  %v207_v45 = vld [vmem:[%s973_s7 + $0x1b8] sm:$0xff] }
  0x3a   : > { %326 = vmatprep.subr.mxu0 %v265_v46  ;;  %697 = vmatprep.subr.mxu1 %v265_v46  ;;  %v174_v46 = vld [vmem:[%s973_s7 + $0xb0] sm:$0xff] }
  0x3b   : > { %327 = vmatpush2.msra.mxu0 %v264_v47  ;;  %729 = vmatpush2.msra.mxu1 %v264_v47  ;;  %v206_v47 = vld [vmem:[%s973_s7 + $0x1b0] sm:$0xff] }
  0x3c   : > { %328 = vmatprep.subr.mxu0 %v263_v48  ;;  %698 = vmatprep.subr.mxu1 %v263_v48  ;;  %v177_v48 = vld [vmem:[%s973_s7 + $0xc8] sm:$0xff] }
  0x3d   : > { %329 = vmatpush2.msra.mxu0 %v262_v49  ;;  %730 = vmatpush2.msra.mxu1 %v262_v49  ;;  %v209_v49 = vld [vmem:[%s973_s7 + $0x1c8] sm:$0xff] }
  0x3e   : > { %330 = vmatprep.subr.mxu0 %v261_v50  ;;  %699 = vmatprep.subr.mxu1 %v261_v50  ;;  %v176_v50 = vld [vmem:[%s973_s7 + $0xc0] sm:$0xff] }
  0x3f   : > { %331 = vmatpush2.msra.mxu0 %v260_v51  ;;  %731 = vmatpush2.msra.mxu1 %v260_v51  ;;  %v208_v51 = vld [vmem:[%s973_s7 + $0x1c0] sm:$0xff] }
  0x40   : > { %332 = vmatprep.subr.mxu0 %v259_v52  ;;  %700 = vmatprep.subr.mxu1 %v259_v52  ;;  %v179_v52 = vld [vmem:[%s973_s7 + $0xd8] sm:$0xff] }
  0x41   : > { %333 = vmatpush2.msra.mxu0 %v258_v53  ;;  %732 = vmatpush2.msra.mxu1 %v258_v53  ;;  %v211_v53 = vld [vmem:[%s973_s7 + $0x1d8] sm:$0xff] }
  0x42   : > { %334 = vmatprep.subr.mxu0 %v257_v54  ;;  %701 = vmatprep.subr.mxu1 %v257_v54  ;;  %v178_v54 = vld [vmem:[%s973_s7 + $0xd0] sm:$0xff] }
  0x43   : > { %335 = vmatpush2.msra.mxu0 %v256_v55  ;;  %733 = vmatpush2.msra.mxu1 %v256_v55  ;;  %v210_v55 = vld [vmem:[%s973_s7 + $0x1d0] sm:$0xff] }
  0x44   : > { %336 = vmatprep.subr.mxu0 %v255_v56  ;;  %702 = vmatprep.subr.mxu1 %v255_v56  ;;  %v181_v56 = vld [vmem:[%s973_s7 + $0xe8] sm:$0xff] }
  0x45   : > { %337 = vmatpush2.msra.mxu0 %v254_v57  ;;  %734 = vmatpush2.msra.mxu1 %v254_v57  ;;  %v213_v57 = vld [vmem:[%s973_s7 + $0x1e8] sm:$0xff] }
  0x46   : > { %338 = vmatprep.subr.mxu0 %v253_v58  ;;  %703 = vmatprep.subr.mxu1 %v253_v58  ;;  %v180_v58 = vld [vmem:[%s973_s7 + $0xe0] sm:$0xff] }
  0x47   : > { %339 = vmatpush2.msra.mxu0 %v252_v59  ;;  %735 = vmatpush2.msra.mxu1 %v252_v59  ;;  %v212_v59 = vld [vmem:[%s973_s7 + $0x1e0] sm:$0xff] }
  0x48   : > { %340 = vmatprep.subr.mxu0 %v251_v60  ;;  %704 = vmatprep.subr.mxu1 %v251_v60  ;;  %v183_v60 = vld [vmem:[%s973_s7 + $0xf8] sm:$0xff] }
  0x49   : > { %341 = vmatpush2.msra.mxu0 %v250_v61  ;;  %736 = vmatpush2.msra.mxu1 %v250_v61  ;;  %v215_v61 = vld [vmem:[%s973_s7 + $0x1f8] sm:$0xff] }
  0x4a   : > { %342 = vmatprep.subr.mxu0 %v249_v62  ;;  %705 = vmatprep.subr.mxu1 %v249_v62  ;;  %v182_v62 = vld [vmem:[%s973_s7 + $0xf0] sm:$0xff] }
  0x4b   : > { %343 = vmatpush2.msra.mxu0 %v248_v63  ;;  %737 = vmatpush2.msra.mxu1 %v248_v63  ;;  %v214_v63 = vld [vmem:[%s973_s7 + $0x1f0] sm:$0xff] }
  0x4c   : > { %344 = vmatprep.mubr.f32.mxu0 %v153_v0  ;;  %440 = vmatprep.mubr.f32.mxu1 %v185_v1 }
  0x4d   : > { %345 = vmatmul.mubr.f32.vlgmr.msra.gmra.mxu0 %v152_v2  ;;  %441 = vmatmul.mubr.f32.vlgmr.msra.gmra.mxu1 %v184_v3 }
  0x4e   : > { %350 = vmatprep.mubr.f32.mxu0 %v155_v4  ;;  %446 = vmatprep.mubr.f32.mxu1 %v187_v5 }
  0x51   : > { %351 = vmatmul.mubr.f32.gmra.mxu0 %v154_v6  ;;  %447 = vmatmul.mubr.f32.gmra.mxu1 %v186_v7 }
  0x52   : > { %356 = vmatprep.mubr.f32.mxu0 %v157_v8  ;;  %452 = vmatprep.mubr.f32.mxu1 %v189_v9 }
  0x55   : > { %357 = vmatmul.mubr.f32.gmra.mxu0 %v156_v10  ;;  %453 = vmatmul.mubr.f32.gmra.mxu1 %v188_v11 }
  0x56   : > { %362 = vmatprep.mubr.f32.mxu0 %v159_v12  ;;  %458 = vmatprep.mubr.f32.mxu1 %v191_v13 }
  0x59   : > { %363 = vmatmul.mubr.f32.gmra.mxu0 %v158_v14  ;;  %459 = vmatmul.mubr.f32.gmra.mxu1 %v190_v15 }
  0x5a   : > { %368 = vmatprep.mubr.f32.mxu0 %v161_v16  ;;  %464 = vmatprep.mubr.f32.mxu1 %v193_v17 }
  0x5d   : > { %369 = vmatmul.mubr.f32.gmra.mxu0 %v160_v18  ;;  %465 = vmatmul.mubr.f32.gmra.mxu1 %v192_v19 }
  0x5e   : > { %374 = vmatprep.mubr.f32.mxu0 %v163_v20  ;;  %470 = vmatprep.mubr.f32.mxu1 %v195_v21 }
  0x61   : > { %375 = vmatmul.mubr.f32.gmra.mxu0 %v162_v22  ;;  %471 = vmatmul.mubr.f32.gmra.mxu1 %v194_v23 }
  0x62   : > { %380 = vmatprep.mubr.f32.mxu0 %v165_v24  ;;  %476 = vmatprep.mubr.f32.mxu1 %v197_v25 }
  0x65   : > { %381 = vmatmul.mubr.f32.gmra.mxu0 %v164_v26  ;;  %477 = vmatmul.mubr.f32.gmra.mxu1 %v196_v27 }
  0x66   : > { %386 = vmatprep.mubr.f32.mxu0 %v167_v28  ;;  %482 = vmatprep.mubr.f32.mxu1 %v199_v29 }
  0x69   : > { %387 = vmatmul.mubr.f32.gmra.mxu0 %v166_v30  ;;  %483 = vmatmul.mubr.f32.gmra.mxu1 %v198_v31 }
  0x6a   : > { %392 = vmatprep.mubr.f32.mxu0 %v169_v32  ;;  %488 = vmatprep.mubr.f32.mxu1 %v201_v33 }
  0x6d   : > { %393 = vmatmul.mubr.f32.gmra.mxu0 %v168_v34  ;;  %489 = vmatmul.mubr.f32.gmra.mxu1 %v200_v35 }
  0x6e   : > { %398 = vmatprep.mubr.f32.mxu0 %v171_v36  ;;  %494 = vmatprep.mubr.f32.mxu1 %v203_v37 }
  0x71   : > { %399 = vmatmul.mubr.f32.gmra.mxu0 %v170_v38  ;;  %495 = vmatmul.mubr.f32.gmra.mxu1 %v202_v39 }
  0x72   : > { %404 = vmatprep.mubr.f32.mxu0 %v173_v40  ;;  %500 = vmatprep.mubr.f32.mxu1 %v205_v41 }
  0x75   : > { %405 = vmatmul.mubr.f32.gmra.mxu0 %v172_v42  ;;  %501 = vmatmul.mubr.f32.gmra.mxu1 %v204_v43 }
  0x76   : > { %410 = vmatprep.mubr.f32.mxu0 %v175_v44  ;;  %506 = vmatprep.mubr.f32.mxu1 %v207_v45 }
  0x79   : > { %411 = vmatmul.mubr.f32.gmra.mxu0 %v174_v46  ;;  %507 = vmatmul.mubr.f32.gmra.mxu1 %v206_v47 }
  0x7a   : > { %416 = vmatprep.mubr.f32.mxu0 %v177_v48  ;;  %512 = vmatprep.mubr.f32.mxu1 %v209_v49 }
  0x7d   : > { %417 = vmatmul.mubr.f32.gmra.mxu0 %v176_v50  ;;  %513 = vmatmul.mubr.f32.gmra.mxu1 %v208_v51 }
  0x7e   : > { %422 = vmatprep.mubr.f32.mxu0 %v179_v52  ;;  %518 = vmatprep.mubr.f32.mxu1 %v211_v53 }
  0x81   : > { %423 = vmatmul.mubr.f32.gmra.mxu0 %v178_v54  ;;  %519 = vmatmul.mubr.f32.gmra.mxu1 %v210_v55 }
  0x82   : > { %428 = vmatprep.mubr.f32.mxu0 %v181_v56  ;;  %524 = vmatprep.mubr.f32.mxu1 %v213_v57 }
  0x85   : > { %429 = vmatmul.mubr.f32.gmra.mxu0 %v180_v58  ;;  %525 = vmatmul.mubr.f32.gmra.mxu1 %v212_v59 }
  0x86   : > { %434 = vmatprep.mubr.f32.mxu0 %v183_v60  ;;  %530 = vmatprep.mubr.f32.mxu1 %v215_v61 }
  0x89   : > { %435 = vmatmul.mubr.f32.gmra.mxu0 %v182_v62  ;;  %531 = vmatmul.mubr.f32.gmra.mxu1 %v214_v63 }
 0x10d   : > { %v346_v0 = vpop.f32.mrf.mxu0  ;;  %v442_v1 = vpop.f32.mrf.mxu1 }
 0x10e   : > { %537 = vst [vmem:[%s1050_s15] sm:$0xff] %v346_v0  ;;  %569 = vst [vmem:[%s1050_s15 + $0x100] sm:$0xff] %v442_v1 }
 0x10f   : > { %v348_v2 = vpop.f32.mrf.mxu0  ;;  %v444_v3 = vpop.f32.mrf.mxu1 }
 0x110   : > { %538 = vst [vmem:[%s1050_s15 + $0x8] sm:$0xff] %v348_v2  ;;  %570 = vst [vmem:[%s1050_s15 + $0x108] sm:$0xff] %v444_v3 }
 0x111   : > { %v352_v4 = vpop.f32.mrf.mxu0  ;;  %v448_v5 = vpop.f32.mrf.mxu1 }
 0x112   : > { %539 = vst [vmem:[%s1050_s15 + $0x10] sm:$0xff] %v352_v4  ;;  %571 = vst [vmem:[%s1050_s15 + $0x110] sm:$0xff] %v448_v5 }
 0x113   : > { %v354_v6 = vpop.f32.mrf.mxu0  ;;  %v450_v7 = vpop.f32.mrf.mxu1 }
 0x114   : > { %540 = vst [vmem:[%s1050_s15 + $0x18] sm:$0xff] %v354_v6  ;;  %572 = vst [vmem:[%s1050_s15 + $0x118] sm:$0xff] %v450_v7 }
 0x115   : > { %v358_v8 = vpop.f32.mrf.mxu0  ;;  %v454_v9 = vpop.f32.mrf.mxu1 }
 0x116   : > { %541 = vst [vmem:[%s1050_s15 + $0x20] sm:$0xff] %v358_v8  ;;  %573 = vst [vmem:[%s1050_s15 + $0x120] sm:$0xff] %v454_v9 }
 0x117   : > { %v360_v10 = vpop.f32.mrf.mxu0  ;;  %v456_v11 = vpop.f32.mrf.mxu1 }
 0x118   : > { %542 = vst [vmem:[%s1050_s15 + $0x28] sm:$0xff] %v360_v10  ;;  %574 = vst [vmem:[%s1050_s15 + $0x128] sm:$0xff] %v456_v11 }
 0x119   : > { %v364_v12 = vpop.f32.mrf.mxu0  ;;  %v460_v13 = vpop.f32.mrf.mxu1 }
 0x11a   : > { %543 = vst [vmem:[%s1050_s15 + $0x30] sm:$0xff] %v364_v12  ;;  %575 = vst [vmem:[%s1050_s15 + $0x130] sm:$0xff] %v460_v13 }
 0x11b   : > { %v366_v14 = vpop.f32.mrf.mxu0  ;;  %v462_v15 = vpop.f32.mrf.mxu1 }
 0x11c   : > { %544 = vst [vmem:[%s1050_s15 + $0x38] sm:$0xff] %v366_v14  ;;  %576 = vst [vmem:[%s1050_s15 + $0x138] sm:$0xff] %v462_v15 }
 0x11d   : > { %v370_v16 = vpop.f32.mrf.mxu0  ;;  %v466_v17 = vpop.f32.mrf.mxu1 }
 0x11e   : > { %545 = vst [vmem:[%s1050_s15 + $0x40] sm:$0xff] %v370_v16  ;;  %577 = vst [vmem:[%s1050_s15 + $0x140] sm:$0xff] %v466_v17 }
 0x11f   : > { %v372_v18 = vpop.f32.mrf.mxu0  ;;  %v468_v19 = vpop.f32.mrf.mxu1 }
 0x120   : > { %546 = vst [vmem:[%s1050_s15 + $0x48] sm:$0xff] %v372_v18  ;;  %578 = vst [vmem:[%s1050_s15 + $0x148] sm:$0xff] %v468_v19 }
 0x121   : > { %v376_v20 = vpop.f32.mrf.mxu0  ;;  %v472_v21 = vpop.f32.mrf.mxu1 }
 0x122   : > { %547 = vst [vmem:[%s1050_s15 + $0x50] sm:$0xff] %v376_v20  ;;  %579 = vst [vmem:[%s1050_s15 + $0x150] sm:$0xff] %v472_v21 }
 0x123   : > { %v378_v22 = vpop.f32.mrf.mxu0  ;;  %v474_v23 = vpop.f32.mrf.mxu1 }
 0x124   : > { %548 = vst [vmem:[%s1050_s15 + $0x58] sm:$0xff] %v378_v22  ;;  %580 = vst [vmem:[%s1050_s15 + $0x158] sm:$0xff] %v474_v23 }
 0x125   : > { %v382_v24 = vpop.f32.mrf.mxu0  ;;  %v478_v25 = vpop.f32.mrf.mxu1 }
 0x126   : > { %549 = vst [vmem:[%s1050_s15 + $0x60] sm:$0xff] %v382_v24  ;;  %581 = vst [vmem:[%s1050_s15 + $0x160] sm:$0xff] %v478_v25 }
 0x127   : > { %v384_v26 = vpop.f32.mrf.mxu0  ;;  %v480_v27 = vpop.f32.mrf.mxu1 }
 0x128   : > { %550 = vst [vmem:[%s1050_s15 + $0x68] sm:$0xff] %v384_v26  ;;  %582 = vst [vmem:[%s1050_s15 + $0x168] sm:$0xff] %v480_v27 }
 0x129   : > { %v388_v28 = vpop.f32.mrf.mxu0  ;;  %v484_v29 = vpop.f32.mrf.mxu1 }
 0x12a   : > { %551 = vst [vmem:[%s1050_s15 + $0x70] sm:$0xff] %v388_v28  ;;  %583 = vst [vmem:[%s1050_s15 + $0x170] sm:$0xff] %v484_v29 }
 0x12b   : > { %v390_v30 = vpop.f32.mrf.mxu0  ;;  %v486_v31 = vpop.f32.mrf.mxu1 }
 0x12c   : > { %552 = vst [vmem:[%s1050_s15 + $0x78] sm:$0xff] %v390_v30  ;;  %584 = vst [vmem:[%s1050_s15 + $0x178] sm:$0xff] %v486_v31 }
 0x12d   : > { %v394_v32 = vpop.f32.mrf.mxu0  ;;  %v490_v33 = vpop.f32.mrf.mxu1 }
 0x12e   : > { %553 = vst [vmem:[%s1050_s15 + $0x80] sm:$0xff] %v394_v32  ;;  %585 = vst [vmem:[%s1050_s15 + $0x180] sm:$0xff] %v490_v33 }
 0x12f   : > { %v396_v34 = vpop.f32.mrf.mxu0  ;;  %v492_v35 = vpop.f32.mrf.mxu1 }
 0x130   : > { %554 = vst [vmem:[%s1050_s15 + $0x88] sm:$0xff] %v396_v34  ;;  %586 = vst [vmem:[%s1050_s15 + $0x188] sm:$0xff] %v492_v35 }
 0x131   : > { %v400_v36 = vpop.f32.mrf.mxu0  ;;  %v496_v37 = vpop.f32.mrf.mxu1 }
 0x132   : > { %555 = vst [vmem:[%s1050_s15 + $0x90] sm:$0xff] %v400_v36  ;;  %587 = vst [vmem:[%s1050_s15 + $0x190] sm:$0xff] %v496_v37 }
 0x133   : > { %v402_v38 = vpop.f32.mrf.mxu0  ;;  %v498_v39 = vpop.f32.mrf.mxu1 }
 0x134   : > { %556 = vst [vmem:[%s1050_s15 + $0x98] sm:$0xff] %v402_v38  ;;  %588 = vst [vmem:[%s1050_s15 + $0x198] sm:$0xff] %v498_v39 }
 0x135   : > { %v406_v40 = vpop.f32.mrf.mxu0  ;;  %v502_v41 = vpop.f32.mrf.mxu1 }
 0x136   : > { %557 = vst [vmem:[%s1050_s15 + $0xa0] sm:$0xff] %v406_v40  ;;  %589 = vst [vmem:[%s1050_s15 + $0x1a0] sm:$0xff] %v502_v41 }
 0x137   : > { %v408_v42 = vpop.f32.mrf.mxu0  ;;  %v504_v43 = vpop.f32.mrf.mxu1 }
 0x138   : > { %558 = vst [vmem:[%s1050_s15 + $0xa8] sm:$0xff] %v408_v42  ;;  %590 = vst [vmem:[%s1050_s15 + $0x1a8] sm:$0xff] %v504_v43 }
 0x139   : > { %v412_v44 = vpop.f32.mrf.mxu0  ;;  %v508_v45 = vpop.f32.mrf.mxu1 }
 0x13a   : > { %559 = vst [vmem:[%s1050_s15 + $0xb0] sm:$0xff] %v412_v44  ;;  %591 = vst [vmem:[%s1050_s15 + $0x1b0] sm:$0xff] %v508_v45 }
 0x13b   : > { %v414_v46 = vpop.f32.mrf.mxu0  ;;  %v510_v47 = vpop.f32.mrf.mxu1 }
 0x13c   : > { %560 = vst [vmem:[%s1050_s15 + $0xb8] sm:$0xff] %v414_v46  ;;  %592 = vst [vmem:[%s1050_s15 + $0x1b8] sm:$0xff] %v510_v47 }
 0x13d   : > { %v418_v48 = vpop.f32.mrf.mxu0  ;;  %v514_v49 = vpop.f32.mrf.mxu1 }
 0x13e   : > { %561 = vst [vmem:[%s1050_s15 + $0xc0] sm:$0xff] %v418_v48  ;;  %593 = vst [vmem:[%s1050_s15 + $0x1c0] sm:$0xff] %v514_v49 }
 0x13f   : > { %v420_v50 = vpop.f32.mrf.mxu0  ;;  %v516_v51 = vpop.f32.mrf.mxu1 }
 0x140   : > { %562 = vst [vmem:[%s1050_s15 + $0xc8] sm:$0xff] %v420_v50  ;;  %594 = vst [vmem:[%s1050_s15 + $0x1c8] sm:$0xff] %v516_v51 }
 0x141   : > { %v424_v52 = vpop.f32.mrf.mxu0  ;;  %v520_v53 = vpop.f32.mrf.mxu1 }
 0x142   : > { %563 = vst [vmem:[%s1050_s15 + $0xd0] sm:$0xff] %v424_v52  ;;  %595 = vst [vmem:[%s1050_s15 + $0x1d0] sm:$0xff] %v520_v53 }
 0x143   : > { %v426_v54 = vpop.f32.mrf.mxu0  ;;  %v522_v55 = vpop.f32.mrf.mxu1 }
 0x144   : > { %564 = vst [vmem:[%s1050_s15 + $0xd8] sm:$0xff] %v426_v54  ;;  %596 = vst [vmem:[%s1050_s15 + $0x1d8] sm:$0xff] %v522_v55 }
 0x145   : > { %v430_v56 = vpop.f32.mrf.mxu0  ;;  %v526_v57 = vpop.f32.mrf.mxu1 }
 0x146   : > { %565 = vst [vmem:[%s1050_s15 + $0xe0] sm:$0xff] %v430_v56  ;;  %597 = vst [vmem:[%s1050_s15 + $0x1e0] sm:$0xff] %v526_v57 }
 0x147   : > { %v432_v58 = vpop.f32.mrf.mxu0  ;;  %v528_v59 = vpop.f32.mrf.mxu1 }
 0x148   : > { %566 = vst [vmem:[%s1050_s15 + $0xe8] sm:$0xff] %v432_v58  ;;  %598 = vst [vmem:[%s1050_s15 + $0x1e8] sm:$0xff] %v528_v59 }
 0x149   : > { %v436_v60 = vpop.f32.mrf.mxu0  ;;  %v532_v61 = vpop.f32.mrf.mxu1 }
 0x14a   : > { %567 = vst [vmem:[%s1050_s15 + $0xf0] sm:$0xff] %v436_v60  ;;  %599 = vst [vmem:[%s1050_s15 + $0x1f0] sm:$0xff] %v532_v61 }
 0x14b   : > { %v438_v62 = vpop.f32.mrf.mxu0  ;;  %v534_v63 = vpop.f32.mrf.mxu1 }
 0x14c   : > { %568 = vst [vmem:[%s1050_s15 + $0xf8] sm:$0xff] %v438_v62  ;;  %600 = vst [vmem:[%s1050_s15 + $0x1f8] sm:$0xff] %v534_v63 }
 0x14d PF: > { %s12_s9 = sadd.s32 1, %s752_s9  }
 0x14e   : > { %p9_p4 = scmp.ge.s32.totalorder %s12_s9, 4  }
 0x150   :  { %11 = sbr.rel (!%p9_p4) target bundleno = 1 (0x1), region = 58 }

// kernel: sage_conv_mean.3
= control target key start
LH: loop header
LB: loop body
LE: loop exit
PB: predicated region body
PF: predicated region fallthrough
CT: control target
= control target key end

     0   :  { %8 = vsyncpa [#allocation7], 0  ;;  %s2695_s0 = inlined_call_operand.vmem [shape: f32[512,512], index: 0, kind: input, shape index: {}]   ;;  %s2696_s1 = inlined_call_operand.vmem [shape: f32[512,256], index: 1, kind: input, shape index: {}, may-alias: {1,2}]   ;;  %s2697_s2 = inlined_call_operand.vmem [shape: f32[512,256], index: 2, kind: input, shape index: {}, may-alias: {1,2}]   ;;  %s2698_s3 = inlined_call_operand.hbm [shape: f32[512,128], index: 3, kind: output, shape index: {}]  }
   0x1   :  { %10 = vsyncpa [#allocation7 + $0x1], 0  ;;  %s1872_s12 = smov 0   ;;  %s1874_s13 = smov 0  }
   0x2   :  { %s1876_s14 = smov 0   ;;  %s1878_s15 = smov 0  }
   0x3   :  { %s1880_s16 = smov 0   ;;  %s1882_s17 = smov 0  }
   0x4   :  { %s1884_s18 = smov 0   ;;  %s1886_s19 = smov 0  }
   0x5   :  { %s1888_s20 = smov 0   ;;  %s1890_s21 = smov 0  }
   0x6 LB: > { %s1490_s22 = sadd.s32 4294967295, %s1846_s21   ;;  %s1491_s23 = sadd.s32 4294967294, %s1846_s21   ;;  %s1846_s21 = sphi %s1890_s21, %s16_s21   ;;  %s1842_s20 = sphi %s1888_s20, %s2718_s20   ;;  %s1838_s19 = sphi %s1886_s19, %s2717_s19   ;;  %s1834_s18 = sphi %s1884_s18, %s2716_s18   ;;  %s1830_s17 = sphi %s1882_s17, %s2715_s17   ;;  %s1826_s16 = sphi %s1880_s16, %s2714_s16   ;;  %s1822_s15 = sphi %s1878_s15, %s2713_s15   ;;  %s1818_s14 = sphi %s1876_s14, %s2712_s14   ;;  %s1814_s13 = sphi %s1874_s13, %s2711_s13   ;;  %s1810_s12 = sphi %s1872_s12, %s2710_s12  }
   0x7   : > { %s25_s24 = sadd.s32 1, %s1838_s19  ;;  %s28_s25 = sadd.s32 1, %s1842_s20 }
   0x8   : > { %p26_p0 = scmp.ge.s32.totalorder %s25_s24, 2  ;;  %s37_s26 = sadd.s32 1, %s1826_s16 }
   0x9   : > { %p44_p1 = scmp.ne.s32.totalorder %s1826_s16, %s1822_s15  ;;  %p45_p2 = scmp.eq.s32.totalorder %s1846_s21, 0 }
   0xa   : > { %s2720_s24 = smov (%p26_p0, %s25_s24), 0  ;;  %s2722_s25 = smov (!%p26_p0, %s28_s25), %s1842_s20 }
   0xb   : > { %2701 = sst [smem:[#allocation9_spill]] %s2720_s24  ;;  %s33_s27 = ssub.s32 %s1838_s19, %s2720_s24 }
   0xc   : > { %p1935_p3 = por %p45_p2, %p44_p1  ;;  %p30_p4 = scmp.ge.s32.totalorder %s2722_s25, 2 }
   0xd   : > { %s63_s29 = sadd.s32 1, %s1818_s14  ;;  %p70_p5 = scmp.ne.s32.totalorder %s1818_s14, %s1814_s13 }
   0xe   : > { %p121_p6 = scmp.eq.s32.totalorder %s1490_s22, 3  ;;  %s2724_s25 = smov (%p30_p4, %s2722_s25), 0 }
   0xf   : > { %2703 = sst [smem:[#allocation10_spill]] %s2724_s25  ;;  %p1946_p7 = por %p70_p5, %p45_p2 }
  0x10   : > { %p1950_p8 = por %p121_p6, %p70_p5  ;;  %s32_s5 = ssub.s32 %s1842_s20, %s2724_s25 }
  0x11   : > { %p126_p9 = scmp.ne.s32.totalorder %s1814_s13, %s1810_s12  ;;  %s34_s6 = sor.u32 %s33_s27, %s32_s5 }
  0x12   : > { %p61_p10 = scmp.eq.s32.totalorder %s32_s5, 0  ;;  %p35_p11 = scmp.eq.s32.totalorder %s34_s6, 0 }
  0x13   : > { %p127_p12 = scmp.eq.s32.totalorder %s1491_s23, 3  ;;  %p1492_p0 = scmp.ge.s32.totalorder %s1846_s21, 1 }
  0x14   : > { %s1959_s7 = scalar_select %p61_p10, %s1818_s14, %s63_s29  }
  0x15   : > { %s1962_s8 = scalar_select %p35_p11, %s1826_s16, %s37_s26  }
  0x16   : > { %p1964_p13 = por %p127_p12, %p126_p9  ;;  %p134_p1 = scmp.lt.s32.totalorder %s1846_s21, 5 }
  0x18   : > { %p1970_p2 = pnand %p1492_p0, %p134_p1 }
  0x19   : > { %p1493_p4 = scmp.ne.s32.totalorder (!%p1970_p2), %s1490_s22, 0 }
  0x1a   : > { %138 = sbr.rel (%p1970_p2) target bundleno = 69 (0x45), region = 12 }
  0x1f   : > { %142 = sbr.rel (%p1493_p4) target bundleno = 69 (0x45), region = 16 }
  0x24   : > { %v1494_v0 = vld [vmem:[%s2697_s2 + $0x8] sm:$0xff]  ;;  %v1495_v1 = vld [vmem:[%s2697_s2 + $0x18] sm:$0xff] }
  0x25   : > { %v1496_v2 = vld [vmem:[%s2697_s2 + $0x28] sm:$0xff]  ;;  %299 = vst [vmem:[#allocation5] sm:$0xff] %v1494_v0  ;;  %301 = vst [vmem:[#allocation5 + $0x8] sm:$0xff] %v1495_v1  ;;  %v1497_v3 = vld [vmem:[%s2697_s2 + $0x38] sm:$0xff] }
  0x26   : > { %303 = vst [vmem:[#allocation5 + $0x10] sm:$0xff] %v1496_v2  ;;  %v1498_v4 = vld [vmem:[%s2697_s2 + $0x48] sm:$0xff]  ;;  %v1499_v5 = vld [vmem:[%s2697_s2 + $0x58] sm:$0xff]  ;;  %305 = vst [vmem:[#allocation5 + $0x18] sm:$0xff] %v1497_v3 }
  0x27   : > { %307 = vst [vmem:[#allocation5 + $0x20] sm:$0xff] %v1498_v4  ;;  %309 = vst [vmem:[#allocation5 + $0x28] sm:$0xff] %v1499_v5  ;;  %v1500_v6 = vld [vmem:[%s2697_s2 + $0x68] sm:$0xff]  ;;  %v1501_v7 = vld [vmem:[%s2697_s2 + $0x78] sm:$0xff] }
  0x28   : > { %v1502_v8 = vld [vmem:[%s2697_s2 + $0x88] sm:$0xff]  ;;  %311 = vst [vmem:[#allocation5 + $0x30] sm:$0xff] %v1500_v6  ;;  %313 = vst [vmem:[#allocation5 + $0x38] sm:$0xff] %v1501_v7  ;;  %v1503_v9 = vld [vmem:[%s2697_s2 + $0x98] sm:$0xff] }
  0x29   : > { %315 = vst [vmem:[#allocation5 + $0x40] sm:$0xff] %v1502_v8  ;;  %v1504_v10 = vld [vmem:[%s2697_s2 + $0xa8] sm:$0xff]  ;;  %v1505_v11 = vld [vmem:[%s2697_s2 + $0xb8] sm:$0xff]  ;;  %317 = vst [vmem:[#allocation5 + $0x48] sm:$0xff] %v1503_v9 }
  0x2a   : > { %319 = vst [vmem:[#allocation5 + $0x50] sm:$0xff] %v1504_v10  ;;  %321 = vst [vmem:[#allocation5 + $0x58] sm:$0xff] %v1505_v11  ;;  %v1506_v12 = vld [vmem:[%s2697_s2 + $0xc8] sm:$0xff]  ;;  %v1507_v13 = vld [vmem:[%s2697_s2 + $0xd8] sm:$0xff] }
  0x2b   : > { %v1508_v14 = vld [vmem:[%s2697_s2 + $0xe8] sm:$0xff]  ;;  %323 = vst [vmem:[#allocation5 + $0x60] sm:$0xff] %v1506_v12  ;;  %325 = vst [vmem:[#allocation5 + $0x68] sm:$0xff] %v1507_v13  ;;  %v1509_v15 = vld [vmem:[%s2697_s2 + $0xf8] sm:$0xff] }
  0x2c   : > { %327 = vst [vmem:[#allocation5 + $0x70] sm:$0xff] %v1508_v14  ;;  %v1510_v16 = vld [vmem:[%s2697_s2 + $0x108] sm:$0xff]  ;;  %v1511_v17 = vld [vmem:[%s2697_s2 + $0x118] sm:$0xff]  ;;  %329 = vst [vmem:[#allocation5 + $0x78] sm:$0xff] %v1509_v15 }
  0x2d   : > { %331 = vst [vmem:[#allocation5 + $0x80] sm:$0xff] %v1510_v16  ;;  %333 = vst [vmem:[#allocation5 + $0x88] sm:$0xff] %v1511_v17  ;;  %v1512_v18 = vld [vmem:[%s2697_s2 + $0x128] sm:$0xff]  ;;  %v1513_v19 = vld [vmem:[%s2697_s2 + $0x138] sm:$0xff] }
  0x2e   : > { %v1514_v20 = vld [vmem:[%s2697_s2 + $0x148] sm:$0xff]  ;;  %335 = vst [vmem:[#allocation5 + $0x90] sm:$0xff] %v1512_v18  ;;  %337 = vst [vmem:[#allocation5 + $0x98] sm:$0xff] %v1513_v19  ;;  %v1515_v21 = vld [vmem:[%s2697_s2 + $0x158] sm:$0xff] }
  0x2f   : > { %339 = vst [vmem:[#allocation5 + $0xa0] sm:$0xff] %v1514_v20  ;;  %v1516_v22 = vld [vmem:[%s2697_s2 + $0x168] sm:$0xff]  ;;  %v1517_v23 = vld [vmem:[%s2697_s2 + $0x178] sm:$0xff]  ;;  %341 = vst [vmem:[#allocation5 + $0xa8] sm:$0xff] %v1515_v21 }
  0x30   : > { %343 = vst [vmem:[#allocation5 + $0xb0] sm:$0xff] %v1516_v22  ;;  %345 = vst [vmem:[#allocation5 + $0xb8] sm:$0xff] %v1517_v23  ;;  %v1518_v24 = vld [vmem:[%s2697_s2 + $0x188] sm:$0xff]  ;;  %v1519_v25 = vld [vmem:[%s2697_s2 + $0x198] sm:$0xff] }
  0x31   : > { %v1520_v26 = vld [vmem:[%s2697_s2 + $0x1a8] sm:$0xff]  ;;  %347 = vst [vmem:[#allocation5 + $0xc0] sm:$0xff] %v1518_v24  ;;  %349 = vst [vmem:[#allocation5 + $0xc8] sm:$0xff] %v1519_v25  ;;  %v1521_v27 = vld [vmem:[%s2697_s2 + $0x1b8] sm:$0xff] }
  0x32   : > { %351 = vst [vmem:[#allocation5 + $0xd0] sm:$0xff] %v1520_v26  ;;  %v1522_v28 = vld [vmem:[%s2697_s2 + $0x1c8] sm:$0xff]  ;;  %v1523_v29 = vld [vmem:[%s2697_s2 + $0x1d8] sm:$0xff]  ;;  %353 = vst [vmem:[#allocation5 + $0xd8] sm:$0xff] %v1521_v27 }
  0x33   : > { %355 = vst [vmem:[#allocation5 + $0xe0] sm:$0xff] %v1522_v28  ;;  %357 = vst [vmem:[#allocation5 + $0xe8] sm:$0xff] %v1523_v29  ;;  %v1524_v30 = vld [vmem:[%s2697_s2 + $0x1e8] sm:$0xff]  ;;  %v1525_v31 = vld [vmem:[%s2697_s2 + $0x1f8] sm:$0xff] }
  0x34   : > { %v1526_v32 = vld [vmem:[%s2697_s2 + $0x208] sm:$0xff]  ;;  %359 = vst [vmem:[#allocation5 + $0xf0] sm:$0xff] %v1524_v30  ;;  %361 = vst [vmem:[#allocation5 + $0xf8] sm:$0xff] %v1525_v31  ;;  %v1527_v33 = vld [vmem:[%s2697_s2 + $0x218] sm:$0xff] }
  0x35   : > { %363 = vst [vmem:[#allocation5 + $0x100] sm:$0xff] %v1526_v32  ;;  %v1528_v34 = vld [vmem:[%s2697_s2 + $0x228] sm:$0xff]  ;;  %v1529_v35 = vld [vmem:[%s2697_s2 + $0x238] sm:$0xff]  ;;  %365 = vst [vmem:[#allocation5 + $0x108] sm:$0xff] %v1527_v33 }
  0x36   : > { %367 = vst [vmem:[#allocation5 + $0x110] sm:$0xff] %v1528_v34  ;;  %369 = vst [vmem:[#allocation5 + $0x118] sm:$0xff] %v1529_v35  ;;  %v1530_v36 = vld [vmem:[%s2697_s2 + $0x248] sm:$0xff]  ;;  %v1531_v37 = vld [vmem:[%s2697_s2 + $0x258] sm:$0xff] }
  0x37   : > { %v1532_v38 = vld [vmem:[%s2697_s2 + $0x268] sm:$0xff]  ;;  %371 = vst [vmem:[#allocation5 + $0x120] sm:$0xff] %v1530_v36  ;;  %373 = vst [vmem:[#allocation5 + $0x128] sm:$0xff] %v1531_v37  ;;  %v1533_v39 = vld [vmem:[%s2697_s2 + $0x278] sm:$0xff] }
  0x38   : > { %375 = vst [vmem:[#allocation5 + $0x130] sm:$0xff] %v1532_v38  ;;  %v1534_v40 = vld [vmem:[%s2697_s2 + $0x288] sm:$0xff]  ;;  %v1535_v41 = vld [vmem:[%s2697_s2 + $0x298] sm:$0xff]  ;;  %377 = vst [vmem:[#allocation5 + $0x138] sm:$0xff] %v1533_v39 }
  0x39   : > { %379 = vst [vmem:[#allocation5 + $0x140] sm:$0xff] %v1534_v40  ;;  %381 = vst [vmem:[#allocation5 + $0x148] sm:$0xff] %v1535_v41  ;;  %v1536_v42 = vld [vmem:[%s2697_s2 + $0x2a8] sm:$0xff]  ;;  %v1537_v43 = vld [vmem:[%s2697_s2 + $0x2b8] sm:$0xff] }
  0x3a   : > { %v1538_v44 = vld [vmem:[%s2697_s2 + $0x2c8] sm:$0xff]  ;;  %383 = vst [vmem:[#allocation5 + $0x150] sm:$0xff] %v1536_v42  ;;  %385 = vst [vmem:[#allocation5 + $0x158] sm:$0xff] %v1537_v43  ;;  %v1539_v45 = vld [vmem:[%s2697_s2 + $0x2d8] sm:$0xff] }
  0x3b   : > { %387 = vst [vmem:[#allocation5 + $0x160] sm:$0xff] %v1538_v44  ;;  %v1540_v46 = vld [vmem:[%s2697_s2 + $0x2e8] sm:$0xff]  ;;  %v1541_v47 = vld [vmem:[%s2697_s2 + $0x2f8] sm:$0xff]  ;;  %389 = vst [vmem:[#allocation5 + $0x168] sm:$0xff] %v1539_v45 }
  0x3c   : > { %391 = vst [vmem:[#allocation5 + $0x170] sm:$0xff] %v1540_v46  ;;  %393 = vst [vmem:[#allocation5 + $0x178] sm:$0xff] %v1541_v47  ;;  %v1542_v48 = vld [vmem:[%s2697_s2 + $0x308] sm:$0xff]  ;;  %v1543_v49 = vld [vmem:[%s2697_s2 + $0x318] sm:$0xff] }
  0x3d   : > { %v1544_v50 = vld [vmem:[%s2697_s2 + $0x328] sm:$0xff]  ;;  %395 = vst [vmem:[#allocation5 + $0x180] sm:$0xff] %v1542_v48  ;;  %397 = vst [vmem:[#allocation5 + $0x188] sm:$0xff] %v1543_v49  ;;  %v1545_v51 = vld [vmem:[%s2697_s2 + $0x338] sm:$0xff] }
  0x3e   : > { %399 = vst [vmem:[#allocation5 + $0x190] sm:$0xff] %v1544_v50  ;;  %v1546_v52 = vld [vmem:[%s2697_s2 + $0x348] sm:$0xff]  ;;  %v1547_v53 = vld [vmem:[%s2697_s2 + $0x358] sm:$0xff]  ;;  %401 = vst [vmem:[#allocation5 + $0x198] sm:$0xff] %v1545_v51 }
  0x3f   : > { %403 = vst [vmem:[#allocation5 + $0x1a0] sm:$0xff] %v1546_v52  ;;  %405 = vst [vmem:[#allocation5 + $0x1a8] sm:$0xff] %v1547_v53  ;;  %v1548_v54 = vld [vmem:[%s2697_s2 + $0x368] sm:$0xff]  ;;  %v1549_v55 = vld [vmem:[%s2697_s2 + $0x378] sm:$0xff] }
  0x40   : > { %v1550_v56 = vld [vmem:[%s2697_s2 + $0x388] sm:$0xff]  ;;  %407 = vst [vmem:[#allocation5 + $0x1b0] sm:$0xff] %v1548_v54  ;;  %409 = vst [vmem:[#allocation5 + $0x1b8] sm:$0xff] %v1549_v55  ;;  %v1551_v57 = vld [vmem:[%s2697_s2 + $0x398] sm:$0xff] }
  0x41   : > { %411 = vst [vmem:[#allocation5 + $0x1c0] sm:$0xff] %v1550_v56  ;;  %v1552_v58 = vld [vmem:[%s2697_s2 + $0x3a8] sm:$0xff]  ;;  %v1553_v59 = vld [vmem:[%s2697_s2 + $0x3b8] sm:$0xff]  ;;  %413 = vst [vmem:[#allocation5 + $0x1c8] sm:$0xff] %v1551_v57 }
  0x42   : > { %415 = vst [vmem:[#allocation5 + $0x1d0] sm:$0xff] %v1552_v58  ;;  %417 = vst [vmem:[#allocation5 + $0x1d8] sm:$0xff] %v1553_v59  ;;  %v1554_v60 = vld [vmem:[%s2697_s2 + $0x3c8] sm:$0xff]  ;;  %v1555_v61 = vld [vmem:[%s2697_s2 + $0x3d8] sm:$0xff] }
  0x43   : > { %v1556_v62 = vld [vmem:[%s2697_s2 + $0x3e8] sm:$0xff]  ;;  %419 = vst [vmem:[#allocation5 + $0x1e0] sm:$0xff] %v1554_v60  ;;  %421 = vst [vmem:[#allocation5 + $0x1e8] sm:$0xff] %v1555_v61  ;;  %v1557_v63 = vld [vmem:[%s2697_s2 + $0x3f8] sm:$0xff] }
  0x44   : > { %423 = vst [vmem:[#allocation5 + $0x1f0] sm:$0xff] %v1556_v62  ;;  %425 = vst [vmem:[#allocation5 + $0x1f8] sm:$0xff] %v1557_v63 }
  0x45 PF: > { %p1558_p5 = scmp.ge.s32.totalorder %s1846_s21, 4 }
  0x47   : > { %432 = sbr.rel (%p1558_p5) target bundleno = 135 (0x87), region = 54 }
  0x4c   : > { %435 = sbr.rel (!%p1935_p3) target bundleno = 115 (0x73), region = 58  ;;  %s437_s24 = sand.u32 (%p1935_p3), 1, %s1826_s16  }
  0x4d   : > { %s1561_s22 = sshll.u32 (%p1935_p3), %s1838_s19, 1  ;;  %s1559_s11 = sshll.u32 (%p1935_p3), %s437_s24, 9 }
  0x4e   : > { %s1580_s23 = sshll.u32 (%p1935_p3), %s1842_s20, 7  ;;  %s2184_s28 = scalar_lea.vmem (%p1935_p3), [#allocation3], %s1559_s11 }
  0x4f   : > { %s443_s26 = sadd.s32 (%p1935_p3), %s1580_s23, %s1561_s22 }
  0x50   : > { %s1563_s27 = sshll.u32 (%p1935_p3), %s443_s26, 3 }
  0x51   : > { %s2179_s25 = scalar_lea.vmem %s2695_s0, %s1563_s27 }
  0x52   : > { %v458_v0 = vld [vmem:[%s2179_s25] sm:$0xff]  ;;  %v460_v1 = vld [vmem:[%s2179_s25 + $0x8] sm:$0xff] }
  0x53   : > { %v462_v2 = vld [vmem:[%s2179_s25 + $0x20] sm:$0xff]  ;;  %459 = vst [vmem:[%s2184_s28] sm:$0xff] %v458_v0  ;;  %461 = vst [vmem:[%s2184_s28 + $0x8] sm:$0xff] %v460_v1  ;;  %v464_v3 = vld [vmem:[%s2179_s25 + $0x28] sm:$0xff] }
  0x54   : > { %463 = vst [vmem:[%s2184_s28 + $0x10] sm:$0xff] %v462_v2  ;;  %v466_v4 = vld [vmem:[%s2179_s25 + $0x40] sm:$0xff]  ;;  %v468_v5 = vld [vmem:[%s2179_s25 + $0x48] sm:$0xff]  ;;  %465 = vst [vmem:[%s2184_s28 + $0x18] sm:$0xff] %v464_v3 }
  0x55   : > { %467 = vst [vmem:[%s2184_s28 + $0x20] sm:$0xff] %v466_v4  ;;  %469 = vst [vmem:[%s2184_s28 + $0x28] sm:$0xff] %v468_v5  ;;  %v470_v6 = vld [vmem:[%s2179_s25 + $0x60] sm:$0xff]  ;;  %v472_v7 = vld [vmem:[%s2179_s25 + $0x68] sm:$0xff] }
  0x56   : > { %v474_v8 = vld [vmem:[%s2179_s25 + $0x80] sm:$0xff]  ;;  %471 = vst [vmem:[%s2184_s28 + $0x30] sm:$0xff] %v470_v6  ;;  %473 = vst [vmem:[%s2184_s28 + $0x38] sm:$0xff] %v472_v7  ;;  %v476_v9 = vld [vmem:[%s2179_s25 + $0x88] sm:$0xff] }
  0x57   : > { %475 = vst [vmem:[%s2184_s28 + $0x40] sm:$0xff] %v474_v8  ;;  %v478_v10 = vld [vmem:[%s2179_s25 + $0xa0] sm:$0xff]  ;;  %v480_v11 = vld [vmem:[%s2179_s25 + $0xa8] sm:$0xff]  ;;  %477 = vst [vmem:[%s2184_s28 + $0x48] sm:$0xff] %v476_v9 }
  0x58   : > { %479 = vst [vmem:[%s2184_s28 + $0x50] sm:$0xff] %v478_v10  ;;  %481 = vst [vmem:[%s2184_s28 + $0x58] sm:$0xff] %v480_v11  ;;  %v482_v12 = vld [vmem:[%s2179_s25 + $0xc0] sm:$0xff]  ;;  %v484_v13 = vld [vmem:[%s2179_s25 + $0xc8] sm:$0xff] }
  0x59   : > { %v486_v14 = vld [vmem:[%s2179_s25 + $0xe0] sm:$0xff]  ;;  %483 = vst [vmem:[%s2184_s28 + $0x60] sm:$0xff] %v482_v12  ;;  %485 = vst [vmem:[%s2184_s28 + $0x68] sm:$0xff] %v484_v13  ;;  %v488_v15 = vld [vmem:[%s2179_s25 + $0xe8] sm:$0xff] }
  0x5a   : > { %487 = vst [vmem:[%s2184_s28 + $0x70] sm:$0xff] %v486_v14  ;;  %v490_v16 = vld [vmem:[%s2179_s25 + $0x100] sm:$0xff]  ;;  %v492_v17 = vld [vmem:[%s2179_s25 + $0x108] sm:$0xff]  ;;  %489 = vst [vmem:[%s2184_s28 + $0x78] sm:$0xff] %v488_v15 }
  0x5b   : > { %491 = vst [vmem:[%s2184_s28 + $0x80] sm:$0xff] %v490_v16  ;;  %493 = vst [vmem:[%s2184_s28 + $0x88] sm:$0xff] %v492_v17  ;;  %v494_v18 = vld [vmem:[%s2179_s25 + $0x120] sm:$0xff]  ;;  %v496_v19 = vld [vmem:[%s2179_s25 + $0x128] sm:$0xff] }
  0x5c   : > { %v498_v20 = vld [vmem:[%s2179_s25 + $0x140] sm:$0xff]  ;;  %495 = vst [vmem:[%s2184_s28 + $0x90] sm:$0xff] %v494_v18  ;;  %497 = vst [vmem:[%s2184_s28 + $0x98] sm:$0xff] %v496_v19  ;;  %v500_v21 = vld [vmem:[%s2179_s25 + $0x148] sm:$0xff] }
  0x5d   : > { %499 = vst [vmem:[%s2184_s28 + $0xa0] sm:$0xff] %v498_v20  ;;  %v502_v22 = vld [vmem:[%s2179_s25 + $0x160] sm:$0xff]  ;;  %v504_v23 = vld [vmem:[%s2179_s25 + $0x168] sm:$0xff]  ;;  %501 = vst [vmem:[%s2184_s28 + $0xa8] sm:$0xff] %v500_v21 }
  0x5e   : > { %503 = vst [vmem:[%s2184_s28 + $0xb0] sm:$0xff] %v502_v22  ;;  %505 = vst [vmem:[%s2184_s28 + $0xb8] sm:$0xff] %v504_v23  ;;  %v506_v24 = vld [vmem:[%s2179_s25 + $0x180] sm:$0xff]  ;;  %v508_v25 = vld [vmem:[%s2179_s25 + $0x188] sm:$0xff] }
  0x5f   : > { %v510_v26 = vld [vmem:[%s2179_s25 + $0x1a0] sm:$0xff]  ;;  %507 = vst [vmem:[%s2184_s28 + $0xc0] sm:$0xff] %v506_v24  ;;  %509 = vst [vmem:[%s2184_s28 + $0xc8] sm:$0xff] %v508_v25  ;;  %v512_v27 = vld [vmem:[%s2179_s25 + $0x1a8] sm:$0xff] }
  0x60   : > { %511 = vst [vmem:[%s2184_s28 + $0xd0] sm:$0xff] %v510_v26  ;;  %v514_v28 = vld [vmem:[%s2179_s25 + $0x1c0] sm:$0xff]  ;;  %v516_v29 = vld [vmem:[%s2179_s25 + $0x1c8] sm:$0xff]  ;;  %513 = vst [vmem:[%s2184_s28 + $0xd8] sm:$0xff] %v512_v27 }
  0x61   : > { %515 = vst [vmem:[%s2184_s28 + $0xe0] sm:$0xff] %v514_v28  ;;  %517 = vst [vmem:[%s2184_s28 + $0xe8] sm:$0xff] %v516_v29  ;;  %v518_v30 = vld [vmem:[%s2179_s25 + $0x1e0] sm:$0xff]  ;;  %v520_v31 = vld [vmem:[%s2179_s25 + $0x1e8] sm:$0xff] }
  0x62   : > { %v522_v32 = vld [vmem:[%s2179_s25 + $0x200] sm:$0xff]  ;;  %519 = vst [vmem:[%s2184_s28 + $0xf0] sm:$0xff] %v518_v30  ;;  %521 = vst [vmem:[%s2184_s28 + $0xf8] sm:$0xff] %v520_v31  ;;  %v524_v33 = vld [vmem:[%s2179_s25 + $0x208] sm:$0xff] }
  0x63   : > { %523 = vst [vmem:[%s2184_s28 + $0x100] sm:$0xff] %v522_v32  ;;  %v526_v34 = vld [vmem:[%s2179_s25 + $0x220] sm:$0xff]  ;;  %v528_v35 = vld [vmem:[%s2179_s25 + $0x228] sm:$0xff]  ;;  %525 = vst [vmem:[%s2184_s28 + $0x108] sm:$0xff] %v524_v33 }
  0x64   : > { %527 = vst [vmem:[%s2184_s28 + $0x110] sm:$0xff] %v526_v34  ;;  %529 = vst [vmem:[%s2184_s28 + $0x118] sm:$0xff] %v528_v35  ;;  %v530_v36 = vld [vmem:[%s2179_s25 + $0x240] sm:$0xff]  ;;  %v532_v37 = vld [vmem:[%s2179_s25 + $0x248] sm:$0xff] }
  0x65   : > { %v534_v38 = vld [vmem:[%s2179_s25 + $0x260] sm:$0xff]  ;;  %531 = vst [vmem:[%s2184_s28 + $0x120] sm:$0xff] %v530_v36  ;;  %533 = vst [vmem:[%s2184_s28 + $0x128] sm:$0xff] %v532_v37  ;;  %v536_v39 = vld [vmem:[%s2179_s25 + $0x268] sm:$0xff] }
  0x66   : > { %535 = vst [vmem:[%s2184_s28 + $0x130] sm:$0xff] %v534_v38  ;;  %v538_v40 = vld [vmem:[%s2179_s25 + $0x280] sm:$0xff]  ;;  %v540_v41 = vld [vmem:[%s2179_s25 + $0x288] sm:$0xff]  ;;  %537 = vst [vmem:[%s2184_s28 + $0x138] sm:$0xff] %v536_v39 }
  0x67   : > { %539 = vst [vmem:[%s2184_s28 + $0x140] sm:$0xff] %v538_v40  ;;  %541 = vst [vmem:[%s2184_s28 + $0x148] sm:$0xff] %v540_v41  ;;  %v542_v42 = vld [vmem:[%s2179_s25 + $0x2a0] sm:$0xff]  ;;  %v544_v43 = vld [vmem:[%s2179_s25 + $0x2a8] sm:$0xff] }
  0x68   : > { %v546_v44 = vld [vmem:[%s2179_s25 + $0x2c0] sm:$0xff]  ;;  %543 = vst [vmem:[%s2184_s28 + $0x150] sm:$0xff] %v542_v42  ;;  %545 = vst [vmem:[%s2184_s28 + $0x158] sm:$0xff] %v544_v43  ;;  %v548_v45 = vld [vmem:[%s2179_s25 + $0x2c8] sm:$0xff] }
  0x69   : > { %547 = vst [vmem:[%s2184_s28 + $0x160] sm:$0xff] %v546_v44  ;;  %v550_v46 = vld [vmem:[%s2179_s25 + $0x2e0] sm:$0xff]  ;;  %v552_v47 = vld [vmem:[%s2179_s25 + $0x2e8] sm:$0xff]  ;;  %549 = vst [vmem:[%s2184_s28 + $0x168] sm:$0xff] %v548_v45 }
  0x6a   : > { %551 = vst [vmem:[%s2184_s28 + $0x170] sm:$0xff] %v550_v46  ;;  %553 = vst [vmem:[%s2184_s28 + $0x178] sm:$0xff] %v552_v47  ;;  %v554_v48 = vld [vmem:[%s2179_s25 + $0x300] sm:$0xff]  ;;  %v556_v49 = vld [vmem:[%s2179_s25 + $0x308] sm:$0xff] }
  0x6b   : > { %v558_v50 = vld [vmem:[%s2179_s25 + $0x320] sm:$0xff]  ;;  %555 = vst [vmem:[%s2184_s28 + $0x180] sm:$0xff] %v554_v48  ;;  %557 = vst [vmem:[%s2184_s28 + $0x188] sm:$0xff] %v556_v49  ;;  %v560_v51 = vld [vmem:[%s2179_s25 + $0x328] sm:$0xff] }
  0x6c   : > { %559 = vst [vmem:[%s2184_s28 + $0x190] sm:$0xff] %v558_v50  ;;  %v562_v52 = vld [vmem:[%s2179_s25 + $0x340] sm:$0xff]  ;;  %v564_v53 = vld [vmem:[%s2179_s25 + $0x348] sm:$0xff]  ;;  %561 = vst [vmem:[%s2184_s28 + $0x198] sm:$0xff] %v560_v51 }
  0x6d   : > { %563 = vst [vmem:[%s2184_s28 + $0x1a0] sm:$0xff] %v562_v52  ;;  %565 = vst [vmem:[%s2184_s28 + $0x1a8] sm:$0xff] %v564_v53  ;;  %v566_v54 = vld [vmem:[%s2179_s25 + $0x360] sm:$0xff]  ;;  %v568_v55 = vld [vmem:[%s2179_s25 + $0x368] sm:$0xff] }
  0x6e   : > { %v570_v56 = vld [vmem:[%s2179_s25 + $0x380] sm:$0xff]  ;;  %567 = vst [vmem:[%s2184_s28 + $0x1b0] sm:$0xff] %v566_v54  ;;  %569 = vst [vmem:[%s2184_s28 + $0x1b8] sm:$0xff] %v568_v55  ;;  %v572_v57 = vld [vmem:[%s2179_s25 + $0x388] sm:$0xff] }
  0x6f   : > { %571 = vst [vmem:[%s2184_s28 + $0x1c0] sm:$0xff] %v570_v56  ;;  %v574_v58 = vld [vmem:[%s2179_s25 + $0x3a0] sm:$0xff]  ;;  %v576_v59 = vld [vmem:[%s2179_s25 + $0x3a8] sm:$0xff]  ;;  %573 = vst [vmem:[%s2184_s28 + $0x1c8] sm:$0xff] %v572_v57 }
  0x70   : > { %575 = vst [vmem:[%s2184_s28 + $0x1d0] sm:$0xff] %v574_v58  ;;  %577 = vst [vmem:[%s2184_s28 + $0x1d8] sm:$0xff] %v576_v59  ;;  %v578_v60 = vld [vmem:[%s2179_s25 + $0x3c0] sm:$0xff]  ;;  %v580_v61 = vld [vmem:[%s2179_s25 + $0x3c8] sm:$0xff] }
  0x71   : > { %v582_v62 = vld [vmem:[%s2179_s25 + $0x3e0] sm:$0xff]  ;;  %579 = vst [vmem:[%s2184_s28 + $0x1e0] sm:$0xff] %v578_v60  ;;  %581 = vst [vmem:[%s2184_s28 + $0x1e8] sm:$0xff] %v580_v61  ;;  %v584_v63 = vld [vmem:[%s2179_s25 + $0x3e8] sm:$0xff] }
  0x72   : > { %583 = vst [vmem:[%s2184_s28 + $0x1f0] sm:$0xff] %v582_v62  ;;  %585 = vst [vmem:[%s2184_s28 + $0x1f8] sm:$0xff] %v584_v63 }
  0x73 PF: > { %591 = sbr.rel (!%p1946_p7) target bundleno = 135 (0x87), region = 81  ;;  %s593_s6 = sand.u32 (%p1946_p7), 1, %s1818_s14  }
  0x74   : > { %s1582_s24 = sshll.u32 (%p1946_p7), %s1842_s20, 9  ;;  %s1564_s22 = sshll.u32 (%p1946_p7), %s593_s6, 8 }
  0x75   : > { %s2318_s26 = scalar_lea.vmem (%p1946_p7), %s2696_s1, %s1582_s24  ;;  %s2323_s30 = scalar_lea.vmem (%p1946_p7), [#allocation4], %s1564_s22 }
  0x76   : > { %v690_v0 = vld [vmem:[%s2318_s26] sm:$0xff] (%p1946_p7)  ;;  %v692_v1 = vld [vmem:[%s2318_s26 + $0x10] sm:$0xff] (%p1946_p7) }
  0x77   : > { %v694_v2 = vld [vmem:[%s2318_s26 + $0x20] sm:$0xff] (%p1946_p7)  ;;  %691 = vst [vmem:[%s2323_s30] sm:$0xff] (%p1946_p7), %v690_v0  ;;  %693 = vst [vmem:[%s2323_s30 + $0x8] sm:$0xff] (%p1946_p7), %v692_v1  ;;  %v696_v3 = vld [vmem:[%s2318_s26 + $0x30] sm:$0xff] (%p1946_p7) }
  0x78   : > { %695 = vst [vmem:[%s2323_s30 + $0x10] sm:$0xff] %v694_v2  ;;  %v698_v4 = vld [vmem:[%s2318_s26 + $0x40] sm:$0xff]  ;;  %v700_v5 = vld [vmem:[%s2318_s26 + $0x50] sm:$0xff]  ;;  %697 = vst [vmem:[%s2323_s30 + $0x18] sm:$0xff] %v696_v3 }
  0x79   : > { %699 = vst [vmem:[%s2323_s30 + $0x20] sm:$0xff] %v698_v4  ;;  %701 = vst [vmem:[%s2323_s30 + $0x28] sm:$0xff] %v700_v5  ;;  %v702_v6 = vld [vmem:[%s2318_s26 + $0x60] sm:$0xff]  ;;  %v704_v7 = vld [vmem:[%s2318_s26 + $0x70] sm:$0xff] }
  0x7a   : > { %v706_v8 = vld [vmem:[%s2318_s26 + $0x80] sm:$0xff]  ;;  %703 = vst [vmem:[%s2323_s30 + $0x30] sm:$0xff] %v702_v6  ;;  %705 = vst [vmem:[%s2323_s30 + $0x38] sm:$0xff] %v704_v7  ;;  %v708_v9 = vld [vmem:[%s2318_s26 + $0x90] sm:$0xff] }
  0x7b   : > { %707 = vst [vmem:[%s2323_s30 + $0x40] sm:$0xff] %v706_v8  ;;  %v710_v10 = vld [vmem:[%s2318_s26 + $0xa0] sm:$0xff]  ;;  %v712_v11 = vld [vmem:[%s2318_s26 + $0xb0] sm:$0xff]  ;;  %709 = vst [vmem:[%s2323_s30 + $0x48] sm:$0xff] %v708_v9 }
  0x7c   : > { %711 = vst [vmem:[%s2323_s30 + $0x50] sm:$0xff] %v710_v10  ;;  %713 = vst [vmem:[%s2323_s30 + $0x58] sm:$0xff] %v712_v11  ;;  %v714_v12 = vld [vmem:[%s2318_s26 + $0xc0] sm:$0xff]  ;;  %v716_v13 = vld [vmem:[%s2318_s26 + $0xd0] sm:$0xff] }
  0x7d   : > { %v718_v14 = vld [vmem:[%s2318_s26 + $0xe0] sm:$0xff]  ;;  %715 = vst [vmem:[%s2323_s30 + $0x60] sm:$0xff] %v714_v12  ;;  %717 = vst [vmem:[%s2323_s30 + $0x68] sm:$0xff] %v716_v13  ;;  %v720_v15 = vld [vmem:[%s2318_s26 + $0xf0] sm:$0xff] }
  0x7e   : > { %719 = vst [vmem:[%s2323_s30 + $0x70] sm:$0xff] %v718_v14  ;;  %v722_v16 = vld [vmem:[%s2318_s26 + $0x100] sm:$0xff]  ;;  %v724_v17 = vld [vmem:[%s2318_s26 + $0x110] sm:$0xff]  ;;  %721 = vst [vmem:[%s2323_s30 + $0x78] sm:$0xff] %v720_v15 }
  0x7f   : > { %723 = vst [vmem:[%s2323_s30 + $0x80] sm:$0xff] %v722_v16  ;;  %725 = vst [vmem:[%s2323_s30 + $0x88] sm:$0xff] %v724_v17  ;;  %v726_v18 = vld [vmem:[%s2318_s26 + $0x120] sm:$0xff]  ;;  %v728_v19 = vld [vmem:[%s2318_s26 + $0x130] sm:$0xff] }
  0x80   : > { %v730_v20 = vld [vmem:[%s2318_s26 + $0x140] sm:$0xff]  ;;  %727 = vst [vmem:[%s2323_s30 + $0x90] sm:$0xff] %v726_v18  ;;  %729 = vst [vmem:[%s2323_s30 + $0x98] sm:$0xff] %v728_v19  ;;  %v732_v21 = vld [vmem:[%s2318_s26 + $0x150] sm:$0xff] }
  0x81   : > { %731 = vst [vmem:[%s2323_s30 + $0xa0] sm:$0xff] %v730_v20  ;;  %v734_v22 = vld [vmem:[%s2318_s26 + $0x160] sm:$0xff]  ;;  %v736_v23 = vld [vmem:[%s2318_s26 + $0x170] sm:$0xff]  ;;  %733 = vst [vmem:[%s2323_s30 + $0xa8] sm:$0xff] %v732_v21 }
  0x82   : > { %735 = vst [vmem:[%s2323_s30 + $0xb0] sm:$0xff] %v734_v22  ;;  %737 = vst [vmem:[%s2323_s30 + $0xb8] sm:$0xff] %v736_v23  ;;  %v738_v24 = vld [vmem:[%s2318_s26 + $0x180] sm:$0xff]  ;;  %v740_v25 = vld [vmem:[%s2318_s26 + $0x190] sm:$0xff] }
  0x83   : > { %v742_v26 = vld [vmem:[%s2318_s26 + $0x1a0] sm:$0xff]  ;;  %739 = vst [vmem:[%s2323_s30 + $0xc0] sm:$0xff] %v738_v24  ;;  %741 = vst [vmem:[%s2323_s30 + $0xc8] sm:$0xff] %v740_v25  ;;  %v744_v27 = vld [vmem:[%s2318_s26 + $0x1b0] sm:$0xff] }
  0x84   : > { %743 = vst [vmem:[%s2323_s30 + $0xd0] sm:$0xff] %v742_v26  ;;  %v746_v28 = vld [vmem:[%s2318_s26 + $0x1c0] sm:$0xff]  ;;  %v748_v29 = vld [vmem:[%s2318_s26 + $0x1d0] sm:$0xff]  ;;  %745 = vst [vmem:[%s2323_s30 + $0xd8] sm:$0xff] %v744_v27 }
  0x85   : > { %747 = vst [vmem:[%s2323_s30 + $0xe0] sm:$0xff] %v746_v28  ;;  %749 = vst [vmem:[%s2323_s30 + $0xe8] sm:$0xff] %v748_v29  ;;  %v750_v30 = vld [vmem:[%s2318_s26 + $0x1e0] sm:$0xff]  ;;  %v752_v31 = vld [vmem:[%s2318_s26 + $0x1f0] sm:$0xff] }
  0x86   : > { %751 = vst [vmem:[%s2323_s30 + $0xf0] sm:$0xff] %v750_v30  ;;  %753 = vst [vmem:[%s2323_s30 + $0xf8] sm:$0xff] %v752_v31 }
  0x87 PF: > { %762 = sbr.rel (%p1970_p2) target bundleno = 526 (0x20e), region = 119  ;;  %s765_s27 = sand.u32 (!%p1970_p2), 1, %s1822_s15  }
  0x88   : > { %s772_s29 = sand.u32 (!%p1970_p2), 1, %s1814_s13   ;;  %s1569_s5 = sshll.u32 (!%p1970_p2), %s765_s27, 9 }
  0x89   : > { %s1570_s25 = sshll.u32 (!%p1970_p2), %s772_s29, 8  ;;  %s2392_s28 = scalar_lea.vmem (!%p1970_p2), [#allocation3], %s1569_s5 }
  0x8a   : > { %s2394_s6 = scalar_lea.vmem (!%p1970_p2), [#allocation4], %s1570_s25  ;;  %s2396_s24 = scalar_lea.vmem (!%p1970_p2), [#allocation6], %s1570_s25 }
  0x8b   : > { %p1572_p3 = scmp.ne.s32.totalorder (!%p1970_p2), %s1830_s17, 0 }
  0x8d   : > { %809 = sbr.rel (%p1572_p3) target bundleno = 163 (0xa3), region = 135 }
  0x92   : > { %v810_v32 = vld [vmem:[%s2394_s6] sm:$0xff]  ;;  %v811_v33 = vld [vmem:[%s2394_s6 + $0x8] sm:$0xff]  ;;  %v812_v34 = vld [vmem:[%s2394_s6 + $0x10] sm:$0xff] }
  0x93   : > { %842 = vst [vmem:[#allocation2 + $0xb0] sm:$0xff] %v810_v32  ;;  %843 = vst [vmem:[#allocation2] sm:$0xff] %v811_v33  ;;  %v813_v35 = vld [vmem:[%s2394_s6 + $0x18] sm:$0xff]  ;;  %v814_v36 = vld [vmem:[%s2394_s6 + $0x20] sm:$0xff] }
  0x94   : > { %844 = vst [vmem:[#allocation2 + $0xd8] sm:$0xff] %v812_v34  ;;  %v815_v37 = vld [vmem:[%s2394_s6 + $0x28] sm:$0xff]  ;;  %845 = vst [vmem:[#allocation2 + $0x18] sm:$0xff] %v813_v35  ;;  %v816_v38 = vld [vmem:[%s2394_s6 + $0x30] sm:$0xff] }
  0x95   : > { %846 = vst [vmem:[#allocation2 + $0x50] sm:$0xff] %v814_v36  ;;  %847 = vst [vmem:[#allocation2 + $0x68] sm:$0xff] %v815_v37  ;;  %v817_v39 = vld [vmem:[%s2394_s6 + $0x38] sm:$0xff]  ;;  %v818_v40 = vld [vmem:[%s2394_s6 + $0x40] sm:$0xff] }
  0x96   : > { %848 = vst [vmem:[#allocation2 + $0x30] sm:$0xff] %v816_v38  ;;  %849 = vst [vmem:[#allocation2 + $0x48] sm:$0xff] %v817_v39  ;;  %v819_v41 = vld [vmem:[%s2394_s6 + $0x48] sm:$0xff]  ;;  %v820_v42 = vld [vmem:[%s2394_s6 + $0x50] sm:$0xff] }
  0x97   : > { %850 = vst [vmem:[#allocation2 + $0x80] sm:$0xff] %v818_v40  ;;  %v821_v43 = vld [vmem:[%s2394_s6 + $0x58] sm:$0xff]  ;;  %851 = vst [vmem:[#allocation2 + $0x88] sm:$0xff] %v819_v41  ;;  %v822_v44 = vld [vmem:[%s2394_s6 + $0x60] sm:$0xff] }
  0x98   : > { %852 = vst [vmem:[#allocation2 + $0xe8] sm:$0xff] %v820_v42  ;;  %853 = vst [vmem:[#allocation2 + $0xb8] sm:$0xff] %v821_v43  ;;  %v823_v45 = vld [vmem:[%s2394_s6 + $0x68] sm:$0xff]  ;;  %v824_v46 = vld [vmem:[%s2394_s6 + $0x70] sm:$0xff] }
  0x99   : > { %854 = vst [vmem:[#allocation2 + $0x60] sm:$0xff] %v822_v44  ;;  %855 = vst [vmem:[#allocation2 + $0xf0] sm:$0xff] %v823_v45  ;;  %v825_v47 = vld [vmem:[%s2394_s6 + $0x78] sm:$0xff]  ;;  %v826_v48 = vld [vmem:[%s2394_s6 + $0x80] sm:$0xff] }
  0x9a   : > { %856 = vst [vmem:[#allocation2 + $0x8] sm:$0xff] %v824_v46  ;;  %v827_v49 = vld [vmem:[%s2394_s6 + $0x88] sm:$0xff]  ;;  %857 = vst [vmem:[#allocation2 + $0x78] sm:$0xff] %v825_v47  ;;  %v828_v50 = vld [vmem:[%s2394_s6 + $0x90] sm:$0xff] }
  0x9b   : > { %858 = vst [vmem:[#allocation2 + $0x38] sm:$0xff] %v826_v48  ;;  %859 = vst [vmem:[#allocation2 + $0x58] sm:$0xff] %v827_v49  ;;  %v829_v51 = vld [vmem:[%s2394_s6 + $0x98] sm:$0xff]  ;;  %v830_v52 = vld [vmem:[%s2394_s6 + $0xa0] sm:$0xff] }
  0x9c   : > { %860 = vst [vmem:[#allocation2 + $0x40] sm:$0xff] %v828_v50  ;;  %861 = vst [vmem:[#allocation2 + $0xc8] sm:$0xff] %v829_v51  ;;  %v831_v53 = vld [vmem:[%s2394_s6 + $0xa8] sm:$0xff]  ;;  %v832_v54 = vld [vmem:[%s2394_s6 + $0xb0] sm:$0xff] }
  0x9d   : > { %862 = vst [vmem:[#allocation2 + $0xe0] sm:$0xff] %v830_v52  ;;  %v833_v55 = vld [vmem:[%s2394_s6 + $0xb8] sm:$0xff]  ;;  %863 = vst [vmem:[#allocation2 + $0x90] sm:$0xff] %v831_v53  ;;  %v834_v56 = vld [vmem:[%s2394_s6 + $0xc0] sm:$0xff] }
  0x9e   : > { %864 = vst [vmem:[#allocation2 + $0x70] sm:$0xff] %v832_v54  ;;  %865 = vst [vmem:[#allocation2 + $0xc0] sm:$0xff] %v833_v55  ;;  %v835_v57 = vld [vmem:[%s2394_s6 + $0xc8] sm:$0xff]  ;;  %v836_v58 = vld [vmem:[%s2394_s6 + $0xd0] sm:$0xff] }
  0x9f   : > { %866 = vst [vmem:[#allocation2 + $0xa8] sm:$0xff] %v834_v56  ;;  %867 = vst [vmem:[#allocation2 + $0xd0] sm:$0xff] %v835_v57  ;;  %v837_v59 = vld [vmem:[%s2394_s6 + $0xd8] sm:$0xff]  ;;  %v838_v60 = vld [vmem:[%s2394_s6 + $0xe0] sm:$0xff] }
  0xa0   : > { %868 = vst [vmem:[#allocation2 + $0x10] sm:$0xff] %v836_v58  ;;  %v839_v61 = vld [vmem:[%s2394_s6 + $0xe8] sm:$0xff]  ;;  %869 = vst [vmem:[#allocation2 + $0x28] sm:$0xff] %v837_v59  ;;  %v840_v62 = vld [vmem:[%s2394_s6 + $0xf0] sm:$0xff] }
  0xa1   : > { %870 = vst [vmem:[#allocation2 + $0xa0] sm:$0xff] %v838_v60  ;;  %871 = vst [vmem:[#allocation2 + $0xf8] sm:$0xff] %v839_v61  ;;  %v841_v63 = vld [vmem:[%s2394_s6 + $0xf8] sm:$0xff] }
  0xa2   : > { %872 = vst [vmem:[#allocation2 + $0x20] sm:$0xff] %v840_v62  ;;  %873 = vst [vmem:[#allocation2 + $0x98] sm:$0xff] %v841_v63 }
  0xa3 PF: > { %s1573_s15 = sshll.u32 %s1830_s17, 8  ;;  %v908_v0 = vld [vmem:[%s2392_s28 + $0x8] sm:$0xff]  ;;  %v1848_v2 = vmov 0.0   ;;  %v907_v35 = vld [vmem:[%s2392_s28] sm:$0xff]  ;;  %v910_v37 = vld [vmem:[%s2392_s28 + $0x18] sm:$0xff]  ;;  %p1574_p6 = scmp.ne.s32.totalorder %s1830_s17, 1 }
  0xa4   : > { %v940_v1 = vld [vmem:[%s2392_s28 + $0x108] sm:$0xff]  ;;  %1004 = vmatprep.subr.mxu0 %v1848_v2  ;;  %1584 = vmatprep.subr.mxu1 %v1848_v2  ;;  %s2436_s10 = scalar_lea.vmem [#allocation5], %s1573_s15  ;;  %v939_v36 = vld [vmem:[%s2392_s28 + $0x100] sm:$0xff]  ;;  %v942_v38 = vld [vmem:[%s2392_s28 + $0x118] sm:$0xff] }
  0xa5   : > { %v987_v3 = vld [vmem:[%s2436_s10 + $0x78] sm:$0xff]  ;;  %v986_v4 = vld [vmem:[%s2436_s10 + $0x70] sm:$0xff]  ;;  %1068 = vmatprep.mubr.f32.mxu0 %v908_v0  ;;  %1148 = vmatprep.mubr.f32.mxu1 %v940_v1  ;;  %v985_v5 = vld [vmem:[%s2436_s10 + $0x68] sm:$0xff] }
  0xa6   : > { %1005 = vmatpush1.msra.mxu0 %v987_v3  ;;  %1616 = vmatpush1.msra.mxu1 %v987_v3  ;;  %v984_v6 = vld [vmem:[%s2436_s10 + $0x60] sm:$0xff]  ;;  %v983_v7 = vld [vmem:[%s2436_s10 + $0x58] sm:$0xff]  ;;  %v982_v8 = vld [vmem:[%s2436_s10 + $0x50] sm:$0xff] }
  0xa7   : > { %1006 = vmatprep.subr.mxu0 %v1848_v2  ;;  %1585 = vmatprep.subr.mxu1 %v1848_v2  ;;  %v981_v9 = vld [vmem:[%s2436_s10 + $0x48] sm:$0xff]  ;;  %v980_v10 = vld [vmem:[%s2436_s10 + $0x40] sm:$0xff]  ;;  %v979_v11 = vld [vmem:[%s2436_s10 + $0x38] sm:$0xff] }
  0xa8   : > { %1007 = vmatpush1.msra.mxu0 %v986_v4  ;;  %1617 = vmatpush1.msra.mxu1 %v986_v4  ;;  %v978_v12 = vld [vmem:[%s2436_s10 + $0x30] sm:$0xff]  ;;  %v977_v13 = vld [vmem:[%s2436_s10 + $0x28] sm:$0xff]  ;;  %v976_v14 = vld [vmem:[%s2436_s10 + $0x20] sm:$0xff] }
  0xa9   : > { %1008 = vmatprep.subr.mxu0 %v1848_v2  ;;  %1586 = vmatprep.subr.mxu1 %v1848_v2  ;;  %v975_v15 = vld [vmem:[%s2436_s10 + $0x18] sm:$0xff]  ;;  %v974_v16 = vld [vmem:[%s2436_s10 + $0x10] sm:$0xff]  ;;  %v973_v17 = vld [vmem:[%s2436_s10 + $0x8] sm:$0xff] }
  0xaa   : > { %1009 = vmatpush1.msra.mxu0 %v985_v5  ;;  %1618 = vmatpush1.msra.mxu1 %v985_v5  ;;  %v972_v18 = vld [vmem:[%s2436_s10] sm:$0xff]  ;;  %v1003_v19 = vld [vmem:[%s2436_s10 + $0xf8] sm:$0xff]  ;;  %v1002_v20 = vld [vmem:[%s2436_s10 + $0xf0] sm:$0xff] }
  0xab   : > { %1010 = vmatprep.subr.mxu0 %v1848_v2  ;;  %1587 = vmatprep.subr.mxu1 %v1848_v2  ;;  %v1001_v21 = vld [vmem:[%s2436_s10 + $0xe8] sm:$0xff]  ;;  %v1000_v22 = vld [vmem:[%s2436_s10 + $0xe0] sm:$0xff]  ;;  %v999_v23 = vld [vmem:[%s2436_s10 + $0xd8] sm:$0xff] }
  0xac   : > { %1011 = vmatpush1.msra.mxu0 %v984_v6  ;;  %1619 = vmatpush1.msra.mxu1 %v984_v6  ;;  %v998_v24 = vld [vmem:[%s2436_s10 + $0xd0] sm:$0xff]  ;;  %v997_v25 = vld [vmem:[%s2436_s10 + $0xc8] sm:$0xff]  ;;  %v996_v26 = vld [vmem:[%s2436_s10 + $0xc0] sm:$0xff] }
  0xad   : > { %1012 = vmatprep.subr.mxu0 %v1848_v2  ;;  %1588 = vmatprep.subr.mxu1 %v1848_v2  ;;  %v995_v27 = vld [vmem:[%s2436_s10 + $0xb8] sm:$0xff]  ;;  %v994_v28 = vld [vmem:[%s2436_s10 + $0xb0] sm:$0xff]  ;;  %v993_v29 = vld [vmem:[%s2436_s10 + $0xa8] sm:$0xff] }
  0xae   : > { %1013 = vmatpush1.msra.mxu0 %v983_v7  ;;  %1620 = vmatpush1.msra.mxu1 %v983_v7  ;;  %v992_v30 = vld [vmem:[%s2436_s10 + $0xa0] sm:$0xff]  ;;  %v991_v31 = vld [vmem:[%s2436_s10 + $0x98] sm:$0xff]  ;;  %v990_v32 = vld [vmem:[%s2436_s10 + $0x90] sm:$0xff] }
  0xaf   : > { %1014 = vmatprep.subr.mxu0 %v1848_v2  ;;  %1589 = vmatprep.subr.mxu1 %v1848_v2  ;;  %v989_v33 = vld [vmem:[%s2436_s10 + $0x88] sm:$0xff]  ;;  %v988_v34 = vld [vmem:[%s2436_s10 + $0x80] sm:$0xff]  ;;  %v909_v39 = vld [vmem:[%s2392_s28 + $0x10] sm:$0xff] }
  0xb0   : > { %1015 = vmatpush1.msra.mxu0 %v982_v8  ;;  %1621 = vmatpush1.msra.mxu1 %v982_v8  ;;  %v941_v40 = vld [vmem:[%s2392_s28 + $0x110] sm:$0xff]  ;;  %v912_v41 = vld [vmem:[%s2392_s28 + $0x28] sm:$0xff]  ;;  %v911_v43 = vld [vmem:[%s2392_s28 + $0x20] sm:$0xff] }
  0xb1   : > { %1016 = vmatprep.subr.mxu0 %v1848_v2  ;;  %1590 = vmatprep.subr.mxu1 %v1848_v2  ;;  %v944_v42 = vld [vmem:[%s2392_s28 + $0x128] sm:$0xff]  ;;  %v943_v44 = vld [vmem:[%s2392_s28 + $0x120] sm:$0xff]  ;;  %v914_v45 = vld [vmem:[%s2392_s28 + $0x38] sm:$0xff] }
  0xb2   : > { %1017 = vmatpush1.msra.mxu0 %v981_v9  ;;  %1622 = vmatpush1.msra.mxu1 %v981_v9  ;;  %v946_v46 = vld [vmem:[%s2392_s28 + $0x138] sm:$0xff]  ;;  %v913_v47 = vld [vmem:[%s2392_s28 + $0x30] sm:$0xff]  ;;  %v916_v49 = vld [vmem:[%s2392_s28 + $0x48] sm:$0xff] }
  0xb3   : > { %1018 = vmatprep.subr.mxu0 %v1848_v2  ;;  %1591 = vmatprep.subr.mxu1 %v1848_v2  ;;  %v945_v48 = vld [vmem:[%s2392_s28 + $0x130] sm:$0xff]  ;;  %v948_v50 = vld [vmem:[%s2392_s28 + $0x148] sm:$0xff]  ;;  %v915_v51 = vld [vmem:[%s2392_s28 + $0x40] sm:$0xff] }
  0xb4   : > { %1019 = vmatpush1.msra.mxu0 %v980_v10  ;;  %1623 = vmatpush1.msra.mxu1 %v980_v10  ;;  %v947_v52 = vld [vmem:[%s2392_s28 + $0x140] sm:$0xff]  ;;  %v918_v53 = vld [vmem:[%s2392_s28 + $0x58] sm:$0xff]  ;;  %v917_v55 = vld [vmem:[%s2392_s28 + $0x50] sm:$0xff] }
  0xb5   : > { %1020 = vmatprep.subr.mxu0 %v1848_v2  ;;  %1592 = vmatprep.subr.mxu1 %v1848_v2  ;;  %v950_v54 = vld [vmem:[%s2392_s28 + $0x158] sm:$0xff]  ;;  %v949_v56 = vld [vmem:[%s2392_s28 + $0x150] sm:$0xff]  ;;  %v920_v57 = vld [vmem:[%s2392_s28 + $0x68] sm:$0xff] }
  0xb6   : > { %1021 = vmatpush1.msra.mxu0 %v979_v11  ;;  %1624 = vmatpush1.msra.mxu1 %v979_v11  ;;  %v952_v58 = vld [vmem:[%s2392_s28 + $0x168] sm:$0xff]  ;;  %v919_v59 = vld [vmem:[%s2392_s28 + $0x60] sm:$0xff]  ;;  %v922_v61 = vld [vmem:[%s2392_s28 + $0x78] sm:$0xff] }
  0xb7   : > { %1022 = vmatprep.subr.mxu0 %v1848_v2  ;;  %1593 = vmatprep.subr.mxu1 %v1848_v2  ;;  %v951_v60 = vld [vmem:[%s2392_s28 + $0x160] sm:$0xff]  ;;  %v954_v62 = vld [vmem:[%s2392_s28 + $0x178] sm:$0xff]  ;;  %v921_v63 = vld [vmem:[%s2392_s28 + $0x70] sm:$0xff] }
  0xb8   : > { %1023 = vmatpush1.msra.mxu0 %v978_v12  ;;  %1625 = vmatpush1.msra.mxu1 %v978_v12  ;;  %v953_v0 = vld [vmem:[%s2392_s28 + $0x170] sm:$0xff]  ;;  %v924_v1 = vld [vmem:[%s2392_s28 + $0x88] sm:$0xff]  ;;  %v923_v3 = vld [vmem:[%s2392_s28 + $0x80] sm:$0xff] }
  0xb9   : > { %1024 = vmatprep.subr.mxu0 %v1848_v2  ;;  %1594 = vmatprep.subr.mxu1 %v1848_v2  ;;  %v955_v4 = vld [vmem:[%s2392_s28 + $0x180] sm:$0xff]  ;;  %v926_v5 = vld [vmem:[%s2392_s28 + $0x98] sm:$0xff]  ;;  %v925_v7 = vld [vmem:[%s2392_s28 + $0x90] sm:$0xff] }
  0xba   : > { %1025 = vmatpush1.msra.mxu0 %v977_v13  ;;  %1626 = vmatpush1.msra.mxu1 %v977_v13  ;;  %v958_v6 = vld [vmem:[%s2392_s28 + $0x198] sm:$0xff]  ;;  %v957_v8 = vld [vmem:[%s2392_s28 + $0x190] sm:$0xff]  ;;  %v928_v9 = vld [vmem:[%s2392_s28 + $0xa8] sm:$0xff] }
  0xbb   : > { %1026 = vmatprep.subr.mxu0 %v1848_v2  ;;  %1595 = vmatprep.subr.mxu1 %v1848_v2  ;;  %v960_v10 = vld [vmem:[%s2392_s28 + $0x1a8] sm:$0xff]  ;;  %v927_v11 = vld [vmem:[%s2392_s28 + $0xa0] sm:$0xff]  ;;  %v930_v13 = vld [vmem:[%s2392_s28 + $0xb8] sm:$0xff] }
  0xbc   : > { %1027 = vmatpush1.msra.mxu0 %v976_v14  ;;  %1627 = vmatpush1.msra.mxu1 %v976_v14  ;;  %v959_v12 = vld [vmem:[%s2392_s28 + $0x1a0] sm:$0xff]  ;;  %v962_v14 = vld [vmem:[%s2392_s28 + $0x1b8] sm:$0xff] }
  0xbd   : > { %1028 = vmatprep.subr.mxu0 %v1848_v2  ;;  %1596 = vmatprep.subr.mxu1 %v1848_v2 }
  0xbe   : > { %1029 = vmatpush1.msra.mxu0 %v975_v15  ;;  %1628 = vmatpush1.msra.mxu1 %v975_v15  ;;  %v929_v15 = vld [vmem:[%s2392_s28 + $0xb0] sm:$0xff] }
  0xbf   : > { %1030 = vmatprep.subr.mxu0 %v1848_v2  ;;  %1597 = vmatprep.subr.mxu1 %v1848_v2 }
  0xc0   : > { %1031 = vmatpush1.msra.mxu0 %v974_v16  ;;  %1629 = vmatpush1.msra.mxu1 %v974_v16  ;;  %v961_v16 = vld [vmem:[%s2392_s28 + $0x1b0] sm:$0xff] }
  0xc1   : > { %1032 = vmatprep.subr.mxu0 %v1848_v2  ;;  %1598 = vmatprep.subr.mxu1 %v1848_v2 }
  0xc2   : > { %1033 = vmatpush1.msra.mxu0 %v973_v17  ;;  %1630 = vmatpush1.msra.mxu1 %v973_v17  ;;  %v932_v17 = vld [vmem:[%s2392_s28 + $0xc8] sm:$0xff] }
  0xc3   : > { %1034 = vmatprep.subr.mxu0 %v1848_v2  ;;  %1599 = vmatprep.subr.mxu1 %v1848_v2 }
  0xc4   : > { %1035 = vmatpush1.msra.mxu0 %v972_v18  ;;  %1631 = vmatpush1.msra.mxu1 %v972_v18  ;;  %v964_v18 = vld [vmem:[%s2392_s28 + $0x1c8] sm:$0xff] }
  0xc5   : > { %1036 = vmatprep.subr.mxu0 %v1848_v2  ;;  %1600 = vmatprep.subr.mxu1 %v1848_v2 }
  0xc6   : > { %1037 = vmatpush2.msra.mxu0 %v1003_v19  ;;  %1632 = vmatpush2.msra.mxu1 %v1003_v19  ;;  %v931_v19 = vld [vmem:[%s2392_s28 + $0xc0] sm:$0xff] }
  0xc7   : > { %1038 = vmatprep.subr.mxu0 %v1848_v2  ;;  %1601 = vmatprep.subr.mxu1 %v1848_v2 }
  0xc8   : > { %1039 = vmatpush2.msra.mxu0 %v1002_v20  ;;  %1633 = vmatpush2.msra.mxu1 %v1002_v20  ;;  %v963_v20 = vld [vmem:[%s2392_s28 + $0x1c0] sm:$0xff] }
  0xc9   : > { %1040 = vmatprep.subr.mxu0 %v1848_v2  ;;  %1602 = vmatprep.subr.mxu1 %v1848_v2 }
  0xca   : > { %1041 = vmatpush2.msra.mxu0 %v1001_v21  ;;  %1634 = vmatpush2.msra.mxu1 %v1001_v21  ;;  %v934_v21 = vld [vmem:[%s2392_s28 + $0xd8] sm:$0xff] }
  0xcb   : > { %1042 = vmatprep.subr.mxu0 %v1848_v2  ;;  %1603 = vmatprep.subr.mxu1 %v1848_v2 }
  0xcc   : > { %1043 = vmatpush2.msra.mxu0 %v1000_v22  ;;  %1635 = vmatpush2.msra.mxu1 %v1000_v22  ;;  %v966_v22 = vld [vmem:[%s2392_s28 + $0x1d8] sm:$0xff] }
  0xcd   : > { %1044 = vmatprep.subr.mxu0 %v1848_v2  ;;  %1604 = vmatprep.subr.mxu1 %v1848_v2 }
  0xce   : > { %1045 = vmatpush2.msra.mxu0 %v999_v23  ;;  %1636 = vmatpush2.msra.mxu1 %v999_v23  ;;  %v933_v23 = vld [vmem:[%s2392_s28 + $0xd0] sm:$0xff] }
  0xcf   : > { %1046 = vmatprep.subr.mxu0 %v1848_v2  ;;  %1605 = vmatprep.subr.mxu1 %v1848_v2 }
  0xd0   : > { %1047 = vmatpush2.msra.mxu0 %v998_v24  ;;  %1637 = vmatpush2.msra.mxu1 %v998_v24  ;;  %v965_v24 = vld [vmem:[%s2392_s28 + $0x1d0] sm:$0xff] }
  0xd1   : > { %1048 = vmatprep.subr.mxu0 %v1848_v2  ;;  %1606 = vmatprep.subr.mxu1 %v1848_v2 }
  0xd2   : > { %1049 = vmatpush2.msra.mxu0 %v997_v25  ;;  %1638 = vmatpush2.msra.mxu1 %v997_v25  ;;  %v936_v25 = vld [vmem:[%s2392_s28 + $0xe8] sm:$0xff] }
  0xd3   : > { %1050 = vmatprep.subr.mxu0 %v1848_v2  ;;  %1607 = vmatprep.subr.mxu1 %v1848_v2 }
  0xd4   : > { %1051 = vmatpush2.msra.mxu0 %v996_v26  ;;  %1639 = vmatpush2.msra.mxu1 %v996_v26  ;;  %v968_v26 = vld [vmem:[%s2392_s28 + $0x1e8] sm:$0xff] }
  0xd5   : > { %1052 = vmatprep.subr.mxu0 %v1848_v2  ;;  %1608 = vmatprep.subr.mxu1 %v1848_v2 }
  0xd6   : > { %1053 = vmatpush2.msra.mxu0 %v995_v27  ;;  %1640 = vmatpush2.msra.mxu1 %v995_v27  ;;  %v935_v27 = vld [vmem:[%s2392_s28 + $0xe0] sm:$0xff] }
  0xd7   : > { %1054 = vmatprep.subr.mxu0 %v1848_v2  ;;  %1609 = vmatprep.subr.mxu1 %v1848_v2 }
  0xd8   : > { %1055 = vmatpush2.msra.mxu0 %v994_v28  ;;  %1641 = vmatpush2.msra.mxu1 %v994_v28  ;;  %v967_v28 = vld [vmem:[%s2392_s28 + $0x1e0] sm:$0xff] }
  0xd9   : > { %1056 = vmatprep.subr.mxu0 %v1848_v2  ;;  %1610 = vmatprep.subr.mxu1 %v1848_v2 }
  0xda   : > { %1057 = vmatpush2.msra.mxu0 %v993_v29  ;;  %1642 = vmatpush2.msra.mxu1 %v993_v29  ;;  %v938_v29 = vld [vmem:[%s2392_s28 + $0xf8] sm:$0xff] }
  0xdb   : > { %1058 = vmatprep.subr.mxu0 %v1848_v2  ;;  %1611 = vmatprep.subr.mxu1 %v1848_v2 }
  0xdc   : > { %1059 = vmatpush2.msra.mxu0 %v992_v30  ;;  %1643 = vmatpush2.msra.mxu1 %v992_v30  ;;  %v970_v30 = vld [vmem:[%s2392_s28 + $0x1f8] sm:$0xff] }
  0xdd   : > { %1060 = vmatprep.subr.mxu0 %v1848_v2  ;;  %1612 = vmatprep.subr.mxu1 %v1848_v2 }
  0xde   : > { %1061 = vmatpush2.msra.mxu0 %v991_v31  ;;  %1644 = vmatpush2.msra.mxu1 %v991_v31  ;;  %v937_v31 = vld [vmem:[%s2392_s28 + $0xf0] sm:$0xff] }
  0xdf   : > { %1062 = vmatprep.subr.mxu0 %v1848_v2  ;;  %1613 = vmatprep.subr.mxu1 %v1848_v2 }
  0xe0   : > { %1063 = vmatpush2.msra.mxu0 %v990_v32  ;;  %1645 = vmatpush2.msra.mxu1 %v990_v32  ;;  %v969_v32 = vld [vmem:[%s2392_s28 + $0x1f0] sm:$0xff] }
  0xe1   : > { %1064 = vmatprep.subr.mxu0 %v1848_v2  ;;  %1614 = vmatprep.subr.mxu1 %v1848_v2 }
  0xe2   : > { %1065 = vmatpush2.msra.mxu0 %v989_v33  ;;  %1646 = vmatpush2.msra.mxu1 %v989_v33  ;;  %v875_v33 = vld [vmem:[#allocation2 + $0xb0] sm:$0xff] }
  0xe3   : > { %1066 = vmatprep.subr.mxu0 %v1848_v2  ;;  %1615 = vmatprep.subr.mxu1 %v1848_v2  ;;  %v956_v2 = vld [vmem:[%s2392_s28 + $0x188] sm:$0xff] }
  0xe4   : > { %1067 = vmatpush2.msra.mxu0 %v988_v34  ;;  %1647 = vmatpush2.msra.mxu1 %v988_v34  ;;  %v891_v34 = vld [vmem:[#allocation2 + $0x38] sm:$0xff] }
  0xe5   : > { %1069 = vmatmul.mubr.f32.vlgmr.msra.gmra.mxu0 %v907_v35  ;;  %1149 = vmatmul.mubr.f32.vlgmr.msra.gmra.mxu1 %v939_v36 }
  0xe6   : > { %1073 = vmatprep.mubr.f32.mxu0 %v910_v37  ;;  %1153 = vmatprep.mubr.f32.mxu1 %v942_v38 }
  0xe9   : > { %1074 = vmatmul.mubr.f32.gmra.mxu0 %v909_v39  ;;  %1154 = vmatmul.mubr.f32.gmra.mxu1 %v941_v40 }
  0xea   : > { %1078 = vmatprep.mubr.f32.mxu0 %v912_v41  ;;  %1158 = vmatprep.mubr.f32.mxu1 %v944_v42  ;;  %v876_v41 = vld [vmem:[#allocation2] sm:$0xff]  ;;  %v892_v42 = vld [vmem:[#allocation2 + $0x58] sm:$0xff] }
  0xed   : > { %1079 = vmatmul.mubr.f32.gmra.mxu0 %v911_v43  ;;  %1159 = vmatmul.mubr.f32.gmra.mxu1 %v943_v44 }
  0xee   : > { %1083 = vmatprep.mubr.f32.mxu0 %v914_v45  ;;  %1163 = vmatprep.mubr.f32.mxu1 %v946_v46 }
  0xf1   : > { %1084 = vmatmul.mubr.f32.gmra.mxu0 %v913_v47  ;;  %1164 = vmatmul.mubr.f32.gmra.mxu1 %v945_v48 }
  0xf2   : > { %1088 = vmatprep.mubr.f32.mxu0 %v916_v49  ;;  %1168 = vmatprep.mubr.f32.mxu1 %v948_v50  ;;  %v877_v49 = vld [vmem:[#allocation2 + $0xd8] sm:$0xff]  ;;  %v893_v50 = vld [vmem:[#allocation2 + $0x40] sm:$0xff] }
  0xf5   : > { %1089 = vmatmul.mubr.f32.gmra.mxu0 %v915_v51  ;;  %1169 = vmatmul.mubr.f32.gmra.mxu1 %v947_v52 }
  0xf6   : > { %1093 = vmatprep.mubr.f32.mxu0 %v918_v53  ;;  %1173 = vmatprep.mubr.f32.mxu1 %v950_v54 }
  0xf9   : > { %1094 = vmatmul.mubr.f32.gmra.mxu0 %v917_v55  ;;  %1174 = vmatmul.mubr.f32.gmra.mxu1 %v949_v56 }
  0xfa   : > { %1098 = vmatprep.mubr.f32.mxu0 %v920_v57  ;;  %1178 = vmatprep.mubr.f32.mxu1 %v952_v58  ;;  %v878_v57 = vld [vmem:[#allocation2 + $0x18] sm:$0xff]  ;;  %v894_v58 = vld [vmem:[#allocation2 + $0xc8] sm:$0xff] }
  0xfd   : > { %1099 = vmatmul.mubr.f32.gmra.mxu0 %v919_v59  ;;  %1179 = vmatmul.mubr.f32.gmra.mxu1 %v951_v60 }
  0xfe   : > { %1103 = vmatprep.mubr.f32.mxu0 %v922_v61  ;;  %1183 = vmatprep.mubr.f32.mxu1 %v954_v62 }
 0x101   : > { %1104 = vmatmul.mubr.f32.gmra.mxu0 %v921_v63  ;;  %1184 = vmatmul.mubr.f32.gmra.mxu1 %v953_v0 }
 0x102   : > { %1108 = vmatprep.mubr.f32.mxu0 %v924_v1  ;;  %1188 = vmatprep.mubr.f32.mxu1 %v956_v2  ;;  %v879_v1 = vld [vmem:[#allocation2 + $0x50] sm:$0xff]  ;;  %v895_v2 = vld [vmem:[#allocation2 + $0xe0] sm:$0xff] }
 0x105   : > { %1109 = vmatmul.mubr.f32.gmra.mxu0 %v923_v3  ;;  %1189 = vmatmul.mubr.f32.gmra.mxu1 %v955_v4 }
 0x106   : > { %1113 = vmatprep.mubr.f32.mxu0 %v926_v5  ;;  %1193 = vmatprep.mubr.f32.mxu1 %v958_v6 }
 0x109   : > { %1114 = vmatmul.mubr.f32.gmra.mxu0 %v925_v7  ;;  %1194 = vmatmul.mubr.f32.gmra.mxu1 %v957_v8 }
 0x10a   : > { %1118 = vmatprep.mubr.f32.mxu0 %v928_v9  ;;  %1198 = vmatprep.mubr.f32.mxu1 %v960_v10  ;;  %v880_v9 = vld [vmem:[#allocation2 + $0x68] sm:$0xff]  ;;  %v896_v10 = vld [vmem:[#allocation2 + $0x90] sm:$0xff] }
 0x10d   : > { %1119 = vmatmul.mubr.f32.gmra.mxu0 %v927_v11  ;;  %1199 = vmatmul.mubr.f32.gmra.mxu1 %v959_v12 }
 0x10e   : > { %1123 = vmatprep.mubr.f32.mxu0 %v930_v13  ;;  %1203 = vmatprep.mubr.f32.mxu1 %v962_v14 }
 0x111   : > { %1124 = vmatmul.mubr.f32.gmra.mxu0 %v929_v15  ;;  %1204 = vmatmul.mubr.f32.gmra.mxu1 %v961_v16 }
 0x112   : > { %1128 = vmatprep.mubr.f32.mxu0 %v932_v17  ;;  %1208 = vmatprep.mubr.f32.mxu1 %v964_v18  ;;  %v881_v17 = vld [vmem:[#allocation2 + $0x30] sm:$0xff] }
 0x113   : > { %v897_v18 = vld [vmem:[#allocation2 + $0x70] sm:$0xff] }
 0x115   : > { %1129 = vmatmul.mubr.f32.gmra.mxu0 %v931_v19  ;;  %1209 = vmatmul.mubr.f32.gmra.mxu1 %v963_v20 }
 0x116   : > { %1133 = vmatprep.mubr.f32.mxu0 %v934_v21  ;;  %1213 = vmatprep.mubr.f32.mxu1 %v966_v22 }
 0x119   : > { %1134 = vmatmul.mubr.f32.gmra.mxu0 %v933_v23  ;;  %1214 = vmatmul.mubr.f32.gmra.mxu1 %v965_v24 }
 0x11a   : > { %1138 = vmatprep.mubr.f32.mxu0 %v936_v25  ;;  %1218 = vmatprep.mubr.f32.mxu1 %v968_v26  ;;  %v882_v25 = vld [vmem:[#allocation2 + $0x48] sm:$0xff]  ;;  %v898_v26 = vld [vmem:[#allocation2 + $0xc0] sm:$0xff] }
 0x11d   : > { %1139 = vmatmul.mubr.f32.gmra.mxu0 %v935_v27  ;;  %1219 = vmatmul.mubr.f32.gmra.mxu1 %v967_v28 }
 0x11e   : > { %1143 = vmatprep.mubr.f32.mxu0 %v938_v29  ;;  %1223 = vmatprep.mubr.f32.mxu1 %v970_v30 }
 0x121   : > { %1144 = vmatmul.mubr.f32.gmra.mxu0 %v937_v31  ;;  %1224 = vmatmul.mubr.f32.gmra.mxu1 %v969_v32 }
 0x1a5   : > { %v1070_v35 = vpop.f32.mrf.mxu0  ;;  %v1150_v36 = vpop.f32.mrf.mxu1 }
 0x1a6   : > { %v1229_v37 = vadd.f32 %v1070_v35, %v875_v33  ;;  %v1245_v38 = vadd.f32 %v1150_v36, %v891_v34  ;;  %v883_v33 = vld [vmem:[#allocation2 + $0x80] sm:$0xff]  ;;  %v899_v34 = vld [vmem:[#allocation2 + $0xa8] sm:$0xff] }
 0x1a7   : > { %v1072_v39 = vpop.f32.mrf.mxu0  ;;  %v1152_v40 = vpop.f32.mrf.mxu1 }
 0x1a8   : > { %1261 = vst [vmem:[#allocation2 + $0xb0] sm:$0xff] %v1229_v37  ;;  %1277 = vst [vmem:[#allocation2 + $0x38] sm:$0xff] %v1245_v38 }
 0x1a9   : > { %v1075_v43 = vpop.f32.mrf.mxu0  ;;  %v1155_v44 = vpop.f32.mrf.mxu1 }
 0x1aa   : > { %v1230_v45 = vadd.f32 %v1075_v43, %v876_v41  ;;  %v1246_v46 = vadd.f32 %v1155_v44, %v892_v42  ;;  %v884_v41 = vld [vmem:[#allocation2 + $0x88] sm:$0xff]  ;;  %v900_v42 = vld [vmem:[#allocation2 + $0xd0] sm:$0xff] }
 0x1ab   : > { %v1077_v47 = vpop.f32.mrf.mxu0  ;;  %v1157_v48 = vpop.f32.mrf.mxu1 }
 0x1ac   : > { %1262 = vst [vmem:[#allocation2] sm:$0xff] %v1230_v45  ;;  %1278 = vst [vmem:[#allocation2 + $0x58] sm:$0xff] %v1246_v46 }
 0x1ad   : > { %v1080_v51 = vpop.f32.mrf.mxu0  ;;  %v1160_v52 = vpop.f32.mrf.mxu1 }
 0x1ae   : > { %v1231_v53 = vadd.f32 %v1080_v51, %v877_v49  ;;  %v1247_v54 = vadd.f32 %v1160_v52, %v893_v50  ;;  %v885_v49 = vld [vmem:[#allocation2 + $0xe8] sm:$0xff]  ;;  %v901_v50 = vld [vmem:[#allocation2 + $0x10] sm:$0xff] }
 0x1af   : > { %v1082_v55 = vpop.f32.mrf.mxu0  ;;  %v1162_v56 = vpop.f32.mrf.mxu1 }
 0x1b0   : > { %1263 = vst [vmem:[#allocation2 + $0xd8] sm:$0xff] %v1231_v53  ;;  %1279 = vst [vmem:[#allocation2 + $0x40] sm:$0xff] %v1247_v54 }
 0x1b1   : > { %v1085_v59 = vpop.f32.mrf.mxu0  ;;  %v1165_v60 = vpop.f32.mrf.mxu1 }
 0x1b2   : > { %v1232_v61 = vadd.f32 %v1085_v59, %v878_v57  ;;  %v1248_v62 = vadd.f32 %v1165_v60, %v894_v58  ;;  %v886_v57 = vld [vmem:[#allocation2 + $0xb8] sm:$0xff]  ;;  %v902_v58 = vld [vmem:[#allocation2 + $0x28] sm:$0xff] }
 0x1b3   : > { %v1087_v63 = vpop.f32.mrf.mxu0  ;;  %v1167_v0 = vpop.f32.mrf.mxu1 }
 0x1b4   : > { %1264 = vst [vmem:[#allocation2 + $0x18] sm:$0xff] %v1232_v61  ;;  %1280 = vst [vmem:[#allocation2 + $0xc8] sm:$0xff] %v1248_v62 }
 0x1b5   : > { %v1090_v3 = vpop.f32.mrf.mxu0  ;;  %v1170_v4 = vpop.f32.mrf.mxu1 }
 0x1b6   : > { %v1233_v5 = vadd.f32 %v1090_v3, %v879_v1  ;;  %v1249_v6 = vadd.f32 %v1170_v4, %v895_v2  ;;  %v887_v1 = vld [vmem:[#allocation2 + $0x60] sm:$0xff] }
 0x1b7   : > { %v1092_v7 = vpop.f32.mrf.mxu0  ;;  %v1172_v8 = vpop.f32.mrf.mxu1  ;;  %v903_v2 = vld [vmem:[#allocation2 + $0xa0] sm:$0xff] }
 0x1b8   : > { %1265 = vst [vmem:[#allocation2 + $0x50] sm:$0xff] %v1233_v5  ;;  %1281 = vst [vmem:[#allocation2 + $0xe0] sm:$0xff] %v1249_v6 }
 0x1b9   : > { %v1095_v11 = vpop.f32.mrf.mxu0  ;;  %v1175_v12 = vpop.f32.mrf.mxu1 }
 0x1ba   : > { %v1234_v13 = vadd.f32 %v1095_v11, %v880_v9  ;;  %v1250_v14 = vadd.f32 %v1175_v12, %v896_v10  ;;  %v888_v9 = vld [vmem:[#allocation2 + $0xf0] sm:$0xff]  ;;  %v904_v10 = vld [vmem:[#allocation2 + $0xf8] sm:$0xff] }
 0x1bb   : > { %v1097_v15 = vpop.f32.mrf.mxu0  ;;  %v1177_v16 = vpop.f32.mrf.mxu1 }
 0x1bc   : > { %1266 = vst [vmem:[#allocation2 + $0x68] sm:$0xff] %v1234_v13  ;;  %1282 = vst [vmem:[#allocation2 + $0x90] sm:$0xff] %v1250_v14 }
 0x1bd   : > { %v1100_v19 = vpop.f32.mrf.mxu0  ;;  %v1180_v20 = vpop.f32.mrf.mxu1 }
 0x1be   : > { %v1235_v21 = vadd.f32 %v1100_v19, %v881_v17  ;;  %v1251_v22 = vadd.f32 %v1180_v20, %v897_v18  ;;  %v889_v17 = vld [vmem:[#allocation2 + $0x8] sm:$0xff]  ;;  %v905_v18 = vld [vmem:[#allocation2 + $0x20] sm:$0xff] }
 0x1bf   : > { %v1102_v23 = vpop.f32.mrf.mxu0  ;;  %v1182_v24 = vpop.f32.mrf.mxu1 }
 0x1c0   : > { %1267 = vst [vmem:[#allocation2 + $0x30] sm:$0xff] %v1235_v21  ;;  %1283 = vst [vmem:[#allocation2 + $0x70] sm:$0xff] %v1251_v22 }
 0x1c1   : > { %v1105_v27 = vpop.f32.mrf.mxu0  ;;  %v1185_v28 = vpop.f32.mrf.mxu1 }
 0x1c2   : > { %v1236_v29 = vadd.f32 %v1105_v27, %v882_v25  ;;  %v1252_v30 = vadd.f32 %v1185_v28, %v898_v26  ;;  %v890_v25 = vld [vmem:[#allocation2 + $0x78] sm:$0xff] }
 0x1c3   : > { %v1107_v31 = vpop.f32.mrf.mxu0  ;;  %v1187_v32 = vpop.f32.mrf.mxu1  ;;  %v906_v26 = vld [vmem:[#allocation2 + $0x98] sm:$0xff] }
 0x1c4   : > { %1268 = vst [vmem:[#allocation2 + $0x48] sm:$0xff] %v1236_v29  ;;  %1284 = vst [vmem:[#allocation2 + $0xc0] sm:$0xff] %v1252_v30 }
 0x1c5   : > { %v1110_v35 = vpop.f32.mrf.mxu0  ;;  %v1190_v36 = vpop.f32.mrf.mxu1 }
 0x1c6   : > { %v1237_v37 = vadd.f32 %v1110_v35, %v883_v33  ;;  %v1253_v38 = vadd.f32 %v1190_v36, %v899_v34 }
 0x1c7   : > { %v1112_v39 = vpop.f32.mrf.mxu0  ;;  %v1192_v40 = vpop.f32.mrf.mxu1 }
 0x1c8   : > { %1269 = vst [vmem:[#allocation2 + $0x80] sm:$0xff] %v1237_v37  ;;  %1285 = vst [vmem:[#allocation2 + $0xa8] sm:$0xff] %v1253_v38 }
 0x1c9   : > { %v1115_v43 = vpop.f32.mrf.mxu0  ;;  %v1195_v44 = vpop.f32.mrf.mxu1 }
 0x1ca   : > { %v1238_v45 = vadd.f32 %v1115_v43, %v884_v41  ;;  %v1254_v46 = vadd.f32 %v1195_v44, %v900_v42 }
 0x1cb   : > { %v1117_v47 = vpop.f32.mrf.mxu0  ;;  %v1197_v48 = vpop.f32.mrf.mxu1 }
 0x1cc   : > { %1270 = vst [vmem:[#allocation2 + $0x88] sm:$0xff] %v1238_v45  ;;  %1286 = vst [vmem:[#allocation2 + $0xd0] sm:$0xff] %v1254_v46 }
 0x1cd   : > { %v1120_v51 = vpop.f32.mrf.mxu0  ;;  %v1200_v52 = vpop.f32.mrf.mxu1 }
 0x1ce   : > { %v1239_v53 = vadd.f32 %v1120_v51, %v885_v49  ;;  %v1255_v54 = vadd.f32 %v1200_v52, %v901_v50 }
 0x1cf   : > { %v1122_v55 = vpop.f32.mrf.mxu0  ;;  %v1202_v56 = vpop.f32.mrf.mxu1 }
 0x1d0   : > { %1271 = vst [vmem:[#allocation2 + $0xe8] sm:$0xff] %v1239_v53  ;;  %1287 = vst [vmem:[#allocation2 + $0x10] sm:$0xff] %v1255_v54 }
 0x1d1   : > { %v1125_v59 = vpop.f32.mrf.mxu0  ;;  %v1205_v60 = vpop.f32.mrf.mxu1 }
 0x1d2   : > { %v1240_v61 = vadd.f32 %v1125_v59, %v886_v57  ;;  %v1256_v62 = vadd.f32 %v1205_v60, %v902_v58 }
 0x1d3   : > { %v1127_v63 = vpop.f32.mrf.mxu0  ;;  %v1207_v0 = vpop.f32.mrf.mxu1 }
 0x1d4   : > { %1272 = vst [vmem:[#allocation2 + $0xb8] sm:$0xff] %v1240_v61  ;;  %1288 = vst [vmem:[#allocation2 + $0x28] sm:$0xff] %v1256_v62 }
 0x1d5   : > { %v1130_v3 = vpop.f32.mrf.mxu0  ;;  %v1210_v4 = vpop.f32.mrf.mxu1 }
 0x1d6   : > { %v1241_v5 = vadd.f32 %v1130_v3, %v887_v1  ;;  %v1257_v6 = vadd.f32 %v1210_v4, %v903_v2 }
 0x1d7   : > { %v1132_v7 = vpop.f32.mrf.mxu0  ;;  %v1212_v8 = vpop.f32.mrf.mxu1 }
 0x1d8   : > { %1273 = vst [vmem:[#allocation2 + $0x60] sm:$0xff] %v1241_v5  ;;  %1289 = vst [vmem:[#allocation2 + $0xa0] sm:$0xff] %v1257_v6 }
 0x1d9   : > { %v1135_v11 = vpop.f32.mrf.mxu0  ;;  %v1215_v12 = vpop.f32.mrf.mxu1 }
 0x1da   : > { %v1242_v13 = vadd.f32 %v1135_v11, %v888_v9  ;;  %v1258_v14 = vadd.f32 %v1215_v12, %v904_v10 }
 0x1db   : > { %v1137_v15 = vpop.f32.mrf.mxu0  ;;  %v1217_v16 = vpop.f32.mrf.mxu1 }
 0x1dc   : > { %1274 = vst [vmem:[#allocation2 + $0xf0] sm:$0xff] %v1242_v13  ;;  %1290 = vst [vmem:[#allocation2 + $0xf8] sm:$0xff] %v1258_v14 }
 0x1dd   : > { %v1140_v19 = vpop.f32.mrf.mxu0  ;;  %v1220_v20 = vpop.f32.mrf.mxu1 }
 0x1de   : > { %v1243_v21 = vadd.f32 %v1140_v19, %v889_v17  ;;  %v1259_v22 = vadd.f32 %v1220_v20, %v905_v18 }
 0x1df   : > { %v1142_v23 = vpop.f32.mrf.mxu0  ;;  %v1222_v24 = vpop.f32.mrf.mxu1 }
 0x1e0   : > { %1275 = vst [vmem:[#allocation2 + $0x8] sm:$0xff] %v1243_v21  ;;  %1291 = vst [vmem:[#allocation2 + $0x20] sm:$0xff] %v1259_v22  ;;  %1296 = sbr.rel (%p1574_p6) target bundleno = 502 (0x1f6), region = 139 }
 0x1e1   : > { %v1145_v27 = vpop.f32.mrf.mxu0  ;;  %v1225_v28 = vpop.f32.mrf.mxu1 }
 0x1e2   : > { %v1244_v29 = vadd.f32 %v1145_v27, %v890_v25  ;;  %v1260_v30 = vadd.f32 %v1225_v28, %v906_v26 }
 0x1e3   : > { %v1147_v31 = vpop.f32.mrf.mxu0  ;;  %v1227_v32 = vpop.f32.mrf.mxu1 }
 0x1e4   : > { %1276 = vst [vmem:[#allocation2 + $0x78] sm:$0xff] %v1244_v29  ;;  %1292 = vst [vmem:[#allocation2 + $0x98] sm:$0xff] %v1260_v30 }
 0x1e5   : > { %v1297_v33 = vld [vmem:[#allocation2 + $0xb0] sm:$0xff]  ;;  %v1298_v34 = vld [vmem:[#allocation2] sm:$0xff]  ;;  %v1299_v35 = vld [vmem:[#allocation2 + $0xd8] sm:$0xff] }
 0x1e6   : > { %1329 = vst [vmem:[%s2396_s24] sm:$0xff] %v1297_v33  ;;  %1330 = vst [vmem:[%s2396_s24 + $0x8] sm:$0xff] %v1298_v34  ;;  %v1300_v36 = vld [vmem:[#allocation2 + $0x18] sm:$0xff]  ;;  %v1301_v37 = vld [vmem:[#allocation2 + $0x50] sm:$0xff] }
 0x1e7   : > { %1331 = vst [vmem:[%s2396_s24 + $0x10] sm:$0xff] %v1299_v35  ;;  %v1302_v38 = vld [vmem:[#allocation2 + $0x68] sm:$0xff]  ;;  %1332 = vst [vmem:[%s2396_s24 + $0x18] sm:$0xff] %v1300_v36  ;;  %v1303_v39 = vld [vmem:[#allocation2 + $0x30] sm:$0xff] }
 0x1e8   : > { %1333 = vst [vmem:[%s2396_s24 + $0x20] sm:$0xff] %v1301_v37  ;;  %1334 = vst [vmem:[%s2396_s24 + $0x28] sm:$0xff] %v1302_v38  ;;  %v1304_v40 = vld [vmem:[#allocation2 + $0x48] sm:$0xff]  ;;  %v1305_v41 = vld [vmem:[#allocation2 + $0x80] sm:$0xff] }
 0x1e9   : > { %1335 = vst [vmem:[%s2396_s24 + $0x30] sm:$0xff] %v1303_v39  ;;  %1336 = vst [vmem:[%s2396_s24 + $0x38] sm:$0xff] %v1304_v40  ;;  %v1306_v42 = vld [vmem:[#allocation2 + $0x88] sm:$0xff]  ;;  %v1308_v44 = vld [vmem:[#allocation2 + $0xb8] sm:$0xff] }
 0x1ea   : > { %1337 = vst [vmem:[%s2396_s24 + $0x40] sm:$0xff] %v1305_v41  ;;  %v1307_v43 = vld [vmem:[#allocation2 + $0xe8] sm:$0xff]  ;;  %1338 = vst [vmem:[%s2396_s24 + $0x48] sm:$0xff] %v1306_v42  ;;  %v1309_v45 = vld [vmem:[#allocation2 + $0x60] sm:$0xff] }
 0x1eb   : > { %1339 = vst [vmem:[%s2396_s24 + $0x50] sm:$0xff] %v1307_v43  ;;  %1340 = vst [vmem:[%s2396_s24 + $0x58] sm:$0xff] %v1308_v44  ;;  %v1310_v46 = vld [vmem:[#allocation2 + $0xf0] sm:$0xff]  ;;  %v1311_v47 = vld [vmem:[#allocation2 + $0x8] sm:$0xff] }
 0x1ec   : > { %1341 = vst [vmem:[%s2396_s24 + $0x60] sm:$0xff] %v1309_v45  ;;  %1342 = vst [vmem:[%s2396_s24 + $0x68] sm:$0xff] %v1310_v46  ;;  %v1312_v48 = vld [vmem:[#allocation2 + $0x78] sm:$0xff]  ;;  %v1315_v51 = vld [vmem:[#allocation2 + $0x40] sm:$0xff] }
 0x1ed   : > { %1343 = vst [vmem:[%s2396_s24 + $0x70] sm:$0xff] %v1311_v47  ;;  %v1313_v49 = vld [vmem:[#allocation2 + $0x38] sm:$0xff]  ;;  %1344 = vst [vmem:[%s2396_s24 + $0x78] sm:$0xff] %v1312_v48  ;;  %v1316_v52 = vld [vmem:[#allocation2 + $0xc8] sm:$0xff] }
 0x1ee   : > { %v1314_v50 = vld [vmem:[#allocation2 + $0x58] sm:$0xff]  ;;  %1345 = vst [vmem:[%s2396_s24 + $0x80] sm:$0xff] %v1313_v49  ;;  %v1317_v53 = vld [vmem:[#allocation2 + $0xe0] sm:$0xff]  ;;  %1347 = vst [vmem:[%s2396_s24 + $0x90] sm:$0xff] %v1315_v51 }
 0x1ef   : > { %1346 = vst [vmem:[%s2396_s24 + $0x88] sm:$0xff] %v1314_v50  ;;  %1348 = vst [vmem:[%s2396_s24 + $0x98] sm:$0xff] %v1316_v52  ;;  %v1318_v54 = vld [vmem:[#allocation2 + $0x90] sm:$0xff]  ;;  %v1320_v56 = vld [vmem:[#allocation2 + $0xc0] sm:$0xff] }
 0x1f0   : > { %1349 = vst [vmem:[%s2396_s24 + $0xa0] sm:$0xff] %v1317_v53  ;;  %v1319_v55 = vld [vmem:[#allocation2 + $0x70] sm:$0xff]  ;;  %1350 = vst [vmem:[%s2396_s24 + $0xa8] sm:$0xff] %v1318_v54  ;;  %v1321_v57 = vld [vmem:[#allocation2 + $0xa8] sm:$0xff] }
 0x1f1   : > { %1351 = vst [vmem:[%s2396_s24 + $0xb0] sm:$0xff] %v1319_v55  ;;  %1352 = vst [vmem:[%s2396_s24 + $0xb8] sm:$0xff] %v1320_v56  ;;  %v1322_v58 = vld [vmem:[#allocation2 + $0xd0] sm:$0xff]  ;;  %v1324_v60 = vld [vmem:[#allocation2 + $0x28] sm:$0xff] }
 0x1f2   : > { %v1323_v59 = vld [vmem:[#allocation2 + $0x10] sm:$0xff]  ;;  %1353 = vst [vmem:[%s2396_s24 + $0xc0] sm:$0xff] %v1321_v57  ;;  %1354 = vst [vmem:[%s2396_s24 + $0xc8] sm:$0xff] %v1322_v58  ;;  %v1325_v61 = vld [vmem:[#allocation2 + $0xa0] sm:$0xff] }
 0x1f3   : > { %1355 = vst [vmem:[%s2396_s24 + $0xd0] sm:$0xff] %v1323_v59  ;;  %v1326_v62 = vld [vmem:[#allocation2 + $0xf8] sm:$0xff]  ;;  %1356 = vst [vmem:[%s2396_s24 + $0xd8] sm:$0xff] %v1324_v60  ;;  %v1327_v63 = vld [vmem:[#allocation2 + $0x20] sm:$0xff] }
 0x1f4   : > { %1357 = vst [vmem:[%s2396_s24 + $0xe0] sm:$0xff] %v1325_v61  ;;  %1358 = vst [vmem:[%s2396_s24 + $0xe8] sm:$0xff] %v1326_v62  ;;  %v1328_v0 = vld [vmem:[#allocation2 + $0x98] sm:$0xff] }
 0x1f5   : > { %1359 = vst [vmem:[%s2396_s24 + $0xf0] sm:$0xff] %v1327_v63  ;;  %1360 = vst [vmem:[%s2396_s24 + $0xf8] sm:$0xff] %v1328_v0 }
 0x1f6 PF: > { %s1583_s17 = sshll.u32 %s1834_s18, 12  ;;  %s1375_s26 = sshll.u32 %s2396_s24, 4  ;;  %s2634_s26 = int_to_ptr.vmem [resolvable:$true] %s1375_s26 }
 0x1f7   : > { %s2631_s23 = scalar_lea.hbm %s2698_s3, %s1583_s17  ;;  %s2638_s30 = scalar_lea.sflag [#allocation7], %s772_s29 }
 0x1f8   : > { %s1738_s27 = scalar_lea.vmem %s2634_s26, 4096  ;;  %s1849_s18 = smov [#allocation6]  }
 0x1f9   : > { %p1739_p7 = scmp.ne.s32.totalorder %s2634_s26, %s1738_s27  ;;  %s1742_s5 = sshll.u32 %s1849_s18, 4  ;;  %s1743_s5 = int_to_ptr.vmem [resolvable:$false] %s1742_s5 }
 0x1fa   : > { %s1744_s25 = scalar_lea.vmem %s1743_s5, 8192  ;;  %p1745_p11 = scmp.lt.s32.totalorder %s2634_s26, %s1743_s5 }
 0x1fb   : > { %p1740_p9 = pnand %p1739_p7, %p1950_p8  ;;  %p1746_p12 = scmp.lt.s32.totalorder %s1744_s25, %s1738_s27 }
 0x1fd   : > { %p1741_p10 = pneg %p1740_p9  ;;  %p1747_p0 = por %p1746_p12, %p1745_p11 }
 0x1ff   : > { %p1748_p1 = pnand %p1747_p0, %p1741_p10 }
 0x201   : > { %1751 = shalt.err (!%p1748_p1)
}
 0x202   : > { %s1752_s29 = scalar_lea.hbm %s2631_s23, 4096  ;;  %s1756_s24 = scalar_lea.hbm %s2698_s3, 8192 }
 0x203   : > { %p1753_p2 = scmp.ne.s32.totalorder %s2631_s23, %s1752_s29  ;;  %p1757_p3 = scmp.lt.s32.totalorder %s2631_s23, %s2698_s3 }
 0x204   : > { %p1758_p6 = scmp.lt.s32.totalorder %s1756_s24, %s1752_s29 }
 0x205   : > { %p1754_p4 = pnand %p1753_p2, %p1950_p8 }
 0x206   : > { %p1759_p7 = por %p1758_p6, %p1757_p3 }
 0x207   : > { %p1755_p5 = pneg %p1754_p4 }
 0x209   : > { %p1760_p9 = pnand %p1759_p7, %p1755_p5 }
 0x20b   : > { %1763 = shalt.err (!%p1760_p9)
}
 0x20c   : > { %s1850_s17 = smov 128   ;;  %s1851_s22 = smov 8  }
 0x20d   : > { %1648 = dma.vmem_to_hbm [thread:$0]  (%p1950_p8), %s2634_s26, 4096, %s2631_s23, %s2638_s30, %s1850_s17, %s1850_s17, %s1851_s22  }
 0x20e PF: > { %p1654_p10 = scmp.ge.s32.totalorder %s1846_s21, 2  ;;  %s1390_s11 = sand.u32 1, %s1810_s12  }
 0x20f   : > { %s1391_s27 = scalar_lea.sflag [#allocation7], %s1390_s11 }
 0x210   : > { %p1651_p11 = pnand %p1654_p10, %p1964_p13 }
 0x212   : > { %p1652_p12 = pneg %p1651_p11 }
 0x214   : > { %1805 = dma.done.wait (%p1652_p12), %s1391_s27, 4096  }
 0x215   : > { %1807 = vsyncadd (%p1652_p12), %s1391_s27, 4294963200  ;;  %s16_s21 = sadd.s32 1, %s1846_s21   ;;  %s2708_s4 = sld [smem:[#allocation9_spill]] }
 0x216   : > { %p13_p0 = scmp.ge.s32.totalorder %s16_s21, 6   ;;  %s2709_s23 = sld [smem:[#allocation10_spill]] }
 0x217   : > { %s2710_s12 = smov %s1814_s13  ;;  %s2711_s13 = smov %s1818_s14 }
 0x218   : > { %s2712_s14 = smov %s1959_s7  ;;  %s2713_s15 = smov %s1826_s16 }
 0x219   : > { %s2714_s16 = smov %s1962_s8  ;;  %s2715_s17 = smov %s1838_s19 }
 0x21a   : > { %s2716_s18 = smov %s1842_s20  ;;  %15 = sbr.rel (!%p13_p0) target bundleno = 6 (0x6), region = 193 }
 0x21b   : > { %s2717_s19 = smov %s2708_s4 }
 0x21c   : > { %s2718_s20 = smov %s2709_s23 }
 0x21f   :  { %1396 = vsyncpa [#allocation7], 1 }
 0x220   :  { %1398 = vsyncpa [#allocation7 + $0x1], 1 }

</bundles_post_ra>
